<compile_context>
chip_gen: v7x
topology: tpu7x:2x2x1
jax: 0.10.0
libtpu: 0.0.40
codegen_flags: <defaults>
</compile_context>

<pallas_src>
import functools

import numpy as np
import jax
import jax.numpy as jnp
from jax import lax
from jax.experimental import pallas as pl
from jax.experimental.pallas import tpu as pltpu


# ------------------------------ fused Pallas kernel ------------------------------

def _fused_kernel(x_ref, bw_ref, bb_ref, wv_ref, pw_ref, hpos_ref, wpos_ref,
                  o_ref, *, He, We):
    """One grid step = one batch element x one channel tile, full (He*We) spatial slab.

    x_ref:  (1, TC, N)   activations, N = He*We flattened row-major on the lane dim
    bw_ref: (TC, 9)      base_conv depthwise 3x3 taps (t = 3*(dh+1)+(dw+1))
    bb_ref: (TC, 1)      base_conv bias
    wv_ref: (4, TC, 9)   wavelet_convs[0] taps per band, wavelet_scale (0.1) folded in
    pw_ref: (Cout, TC)   pointwise 1x1 weights (this channel tile's columns)
    hpos/wpos_ref: (1,N) int32 lane->row / lane->col maps (precomputed, avoids int div)
    o_ref:  (1, Cout, N) output, accumulated over channel tiles (grid axis 1)
    """
    TC = x_ref.shape[1]
    N = x_ref.shape[2]
    Cout = o_ref.shape[1]

    x = x_ref[0]                                    # (TC, N) f32
    dt = x.dtype
    bw = bw_ref[...]                                # (TC, 9)   load weights once
    bb = bb_ref[...]                                # (TC, 1)
    wv = wv_ref[...]                                # (4, TC, 9)
    pw = pw_ref[...]                                # (Cout, TC)
    hpos = hpos_ref[...]                            # (1, N) int32 = idx // We
    wpos = wpos_ref[...]                            # (1, N) int32 = idx %  We

    h_odd = (hpos & 1) == 1
    w_odd = (wpos & 1) == 1
    one = jnp.ones((1, N), dt)
    sh = jnp.where(h_odd, -one, one)                # +1 on even rows, -1 on odd rows
    sw = jnp.where(w_odd, -one, one)
    shw = sh * sw

    def lane_shift(v, s):
        # Static lane shift of the flattened (row-major) image; lanes shifted in from
        # outside the slab are zero-filled.  No boundary masking here.
        if s == 0:
            return v
        if s > 0:
            return jnp.concatenate(
                [v[:, s:], jnp.zeros((v.shape[0], s), v.dtype)], axis=1)
        return jnp.concatenate(
            [jnp.zeros((v.shape[0], -s), v.dtype), v[:, :s]], axis=1)

    def shift_img(v, dh, dw):
        # v viewed as (TC, He, We): returns v(h+dh, w+dw) with zeros outside the image
        # ('same' zero padding) -- lane shift + boundary mask, no padded copies.
        out = lane_shift(v, dh * We + dw)
        if dh == 0 and dw == 0:
            return out
        valid = ((hpos >= -dh) & (hpos < He - dh) &
                 (wpos >= -dw) & (wpos < We - dw))
        return jnp.where(valid, out, 0.0)

    def haar_mix(v, vE, vWst, vS, vN):
        # Orthonormal Haar 2x2 butterfly applied within each 2x2 block, fully interleaved.
        # The same map is the forward DWT (on x) and the inverse IWT (on the interleaved
        # band field): M = 0.5*[[1,1,1,1],[1,1,-1,-1],[1,-1,1,-1],[1,-1,-1,1]] (M@M = I).
        # vE/vWst/vS/vN are v at (h,w+1)/(h,w-1)/(h+1,w)/(h-1,w); the selected pair
        # partner is always in-image (He,We even), so no boundary masks are needed.
        vW = jnp.where(w_odd, vWst, vE)                               # W pair partner
        vH = jnp.where(h_odd, vN, vS)                                 # H pair partner
        vD = jnp.where(w_odd, lane_shift(vH, -1), lane_shift(vH, 1))  # diagonal partner
        return 0.5 * (v + sh * vW + sw * vH + shw * vD)

    taps = [(dh, dw) for dh in (-1, 0, 1) for dw in (-1, 0, 1)]  # t = 3*(dh+1)+(dw+1)

    # 3x3 neighbourhood of x ('same' zero-padded), shared by base conv + forward DWT.
    xsh = [shift_img(x, dh, dw) for (dh, dw) in taps]

    # ---- wavelet branch --------------------------------------------------------
    bnd = haar_mix(x, xsh[5], xsh[3], xsh[7], xsh[1])   # interleaved band field (TC, N)
    # per-band 3x3 'same' conv on the half-res band grid == dilation-2 conv here
    bsh = [shift_img(bnd, 2 * dh, 2 * dw) for (dh, dw) in taps]
    # phase masks pick which band's kernel applies at each interleaved position
    m = [jnp.where((~h_odd) & (~w_odd), one, 0.0),
         jnp.where((~h_odd) & w_odd, one, 0.0),
         jnp.where(h_odd & (~w_odd), one, 0.0),
         jnp.where(h_odd & w_odd, one, 0.0)]
    cf = jnp.zeros_like(x)
    for k in range(4):
        conv_k = jnp.zeros_like(x)
        for t in range(9):
            conv_k = conv_k + wv[k, :, t:t + 1] * bsh[t]
        cf = cf + m[k] * conv_k
    # inverse DWT (same butterfly); unmasked axial shifts are safe (partner in-image).
    x_tag = haar_mix(cf, lane_shift(cf, 1), lane_shift(cf, -1),
                     lane_shift(cf, We), lane_shift(cf, -We))

    # ---- base depthwise 3x3 conv + bias (base_scale == 1.0) --------------------
    base = jnp.zeros_like(x)
    for t in range(9):
        base = base + bw[:, t:t + 1] * xsh[t]
    base = base + bb

    y = base + x_tag                                # WTConv2d output, this channel tile

    # ---- 1x1 pointwise: MXU matmul for real channel counts, VPU MACs for tiny C ----
    @pl.when(pl.program_id(1) == 0)
    def _init():
        o_ref[...] = jnp.zeros_like(o_ref)

    if TC >= 16:
        acc = jnp.dot(pw, y, preferred_element_type=jnp.float32)     # (Cout, N) on MXU
    else:
        acc = jnp.zeros((Cout, N), dt)
        for ci in range(TC):
            acc = acc + pw[:, ci:ci + 1] * y[ci:ci + 1, :]
    o_ref[0] = o_ref[0] + acc


# ------------------------------ forward wrapper ------------------------------

@jax.jit
def dsconv_wt_forward(x_nchw, base_w_t, base_b_t, wave_w_t, pw_w_t):
    """Forward of DSConvWithWT (WTConv2d: kernel_size=3, stride=1, wt_levels=1, db1).

    x_nchw:   (B, C, H, W)  float32, PyTorch layout.
    base_w_t: (C, 3, 3)     == base_conv.weight[:, 0]
    base_b_t: (C,)          == base_conv.bias
    wave_w_t: (4*C, 3, 3)   == wavelet_convs[0].weight[:, 0]  (channel index c*4 + band)
    pw_w_t:   (Cout, C)     == pointwise.weight[:, :, 0, 0]
    returns:  (B, Cout, H, W)
    """
    B, C, H, W = x_nchw.shape
    Cout = pw_w_t.shape[0]
    f32 = jnp.float32

    # Pad to even spatial size only when needed (matches the module's F.pad; a zero-pad
    # 'same' conv cropped back is identical on the kept rows/cols).  No-op for the test.
    He, We = H + (H % 2), W + (W % 2)
    assert He >= 4, "spatial H must be >= 3 for the flattened lane-shift scheme"
    x = x_nchw.astype(f32)
    if (He, We) != (H, W):
        x = jnp.pad(x, ((0, 0), (0, 0), (0, He - H), (0, We - W)))
    N = He * We
    xf = x.reshape(B, C, N)                                   # free: contiguous fold

    # parameter packing (tiny, host/XLA side)
    base_w = base_w_t.reshape(C, 9).astype(f32)               # (C, 9)
    base_b = base_b_t.reshape(C, 1).astype(f32)               # (C, 1)
    wv = (wave_w_t.reshape(C, 4, 9).transpose(1, 0, 2)        # (4, C, 9), band-major
          * f32(0.1)).astype(f32)                             # wavelet_scale folded in
    pw = pw_w_t.astype(f32)                                   # (Cout, C)

    # lane -> (row, col) maps; computed once outside so the kernel needs no int div/mod
    idx = jnp.arange(N, dtype=jnp.int32)
    hpos = (idx // We).reshape(1, N)
    wpos = (idx % We).reshape(1, N)

    # channel tiling: the grid's second ("arbitrary") axis reduces over channel tiles
    # into the revisited output block.
    if C <= 128:
        TC = C
    else:
        assert C % 128 == 0, "channel tiling expects C % 128 == 0 for large C"
        TC = 128
    nC = C // TC
    # TODO(synk): add an H-tiled grid axis with halo blocks (or pltpu.emit_pipeline) for
    # images where a (TC, H*W) slab no longer fits comfortably in VMEM.
    # TODO(synk): wt_levels > 1 / stride > 1 / kernel_size != 3 WTConv2d configs are not
    # implemented (DSConvWithWT uses kernel_size=3 -> wt_levels=1, stride=1).

    kernel = functools.partial(_fused_kernel, He=He, We=We)
    out = pl.pallas_call(
        kernel,
        out_shape=jax.ShapeDtypeStruct((B, Cout, N), f32),
        grid=(B, nC),
        in_specs=[
            pl.BlockSpec((1, TC, N), lambda b, c: (b, c, 0)),   # x
            pl.BlockSpec((TC, 9), lambda b, c: (c, 0)),         # base 3x3 taps
            pl.BlockSpec((TC, 1), lambda b, c: (c, 0)),         # base bias
            pl.BlockSpec((4, TC, 9), lambda b, c: (0, c, 0)),   # wavelet taps (*0.1)
            pl.BlockSpec((Cout, TC), lambda b, c: (0, c)),      # pointwise weights
            pl.BlockSpec((1, N), lambda b, c: (0, 0)),          # hpos
            pl.BlockSpec((1, N), lambda b, c: (0, 0)),          # wpos
        ],
        out_specs=pl.BlockSpec((1, Cout, N), lambda b, c: (b, 0, 0)),
        compiler_params=pltpu.CompilerParams(
            dimension_semantics=("parallel", "arbitrary"),
            vmem_limit_bytes=32 * 1024 * 1024,
        ),
    )(xf, base_w, base_b, wv, pw, hpos, wpos)

    out = out.reshape(B, Cout, He, We)
    if (He, We) != (H, W):
        out = out[:, :, :H, :W]
    return out


# --------------------- pure-JAX (lax.conv) reference check ---------------------

def reference_forward(x_nchw, base_w_t, base_b_t, wave_w_t, pw_w_t):
    B, C, H, W = x_nchw.shape
    dn = ('NCHW', 'OIHW', 'NCHW')
    prec = lax.Precision.HIGHEST
    r = np.float32(1.0 / np.sqrt(2.0))
    lo = jnp.array([r, r], jnp.float32)
    hi = jnp.array([r, -r], jnp.float32)
    # db1 dec/rec filters exactly as create_wavelet_filter builds them (identical for Haar)
    f = jnp.stack([jnp.outer(lo, lo), jnp.outer(hi, lo),
                   jnp.outer(lo, hi), jnp.outer(hi, hi)], axis=0)    # (4, 2, 2)
    dec = jnp.tile(f, (C, 1, 1))[:, None]                            # (4C, 1, 2, 2), idx c*4+k

    xp = jnp.pad(x_nchw, ((0, 0), (0, 0), (0, H % 2), (0, W % 2)))
    # wavelet_transform: stride-2 grouped conv, pad 0
    cx = lax.conv_general_dilated(xp, dec, (2, 2), 'VALID',
                                  feature_group_count=C, dimension_numbers=dn,
                                  precision=prec)
    # wavelet depthwise conv (groups=4C, no bias) * wavelet_scale(0.1)
    ct = lax.conv_general_dilated(cx, wave_w_t[:, None], (1, 1), ((1, 1), (1, 1)),
                                  feature_group_count=4 * C, dimension_numbers=dn,
                                  precision=prec) * 0.1
    # inverse_wavelet_transform: conv_transpose2d(stride=2, pad=0, groups=C) expressed as
    # an lhs-dilated grouped conv with spatially flipped kernels.
    rec_fwd = jnp.flip(dec[:, 0], axis=(1, 2)).reshape(C, 4, 2, 2)
    x_tag = lax.conv_general_dilated(ct, rec_fwd, (1, 1), ((1, 1), (1, 1)),
                                     lhs_dilation=(2, 2), feature_group_count=C,
                                     dimension_numbers=dn, precision=prec)
    x_tag = x_tag[:, :, :H, :W]
    # base path
    base = lax.conv_general_dilated(x_nchw, base_w_t[:, None], (1, 1), ((1, 1), (1, 1)),
                                    feature_group_count=C, dimension_numbers=dn,
                                    precision=prec)
    base = base + base_b_t[None, :, None, None]                      # base_scale = 1.0
    y = base + x_tag
    # pointwise 1x1, no bias
    return lax.conv_general_dilated(y, pw_w_t[:, :, None, None], (1, 1), 'VALID',
                                    dimension_numbers=dn, precision=prec)


# ----------------------------------- main -----------------------------------

if __name__ == "__main__":
    key = jax.random.PRNGKey(0)
    k_x, k1, k2, k3, k4 = jax.random.split(key, 5)

    B, C_in, C_out, H, W = 2, 4, 8, 16, 16
    x = jax.random.normal(k_x, (B, C_in, H, W), jnp.float32)

    # Deterministic synthetic parameters (shapes per the module's __init__).
    base_w_t = jax.random.normal(k1, (C_in, 3, 3), jnp.float32) * 0.2      # base_conv.weight
    base_b_t = jax.random.normal(k2, (C_in,), jnp.float32) * 0.1           # base_conv.bias
    wave_w_t = jax.random.normal(k3, (4 * C_in, 3, 3), jnp.float32) * 0.2  # wavelet_convs[0].weight
    pw_w_t = jax.random.normal(k4, (C_out, C_in), jnp.float32) * 0.2       # pointwise.weight

    out = jax.block_until_ready(dsconv_wt_forward(x, base_w_t, base_b_t, wave_w_t, pw_w_t))
    assert out.shape == (B, C_out, H, W)

    ref = jax.block_until_ready(reference_forward(x, base_w_t, base_b_t, wave_w_t, pw_w_t))
    np.testing.assert_allclose(np.asarray(out), np.asarray(ref), rtol=1e-4, atol=1e-4)

    print("KERNEL_OK")
</pallas_src>

<mosaic_0001>
module attributes {stable_mosaic.version = 11 : i64} {
  func.func @_fused_kernel(%arg0: i32, %arg1: i32, %arg2: memref<1x4x256xf32, #tpu.memory_space<vmem>>, %arg3: memref<4x9xf32, #tpu.memory_space<vmem>>, %arg4: memref<4x1xf32, #tpu.memory_space<vmem>>, %arg5: memref<4x4x9xf32, #tpu.memory_space<vmem>>, %arg6: memref<8x4xf32, #tpu.memory_space<vmem>>, %arg7: memref<1x256xi32, #tpu.memory_space<vmem>>, %arg8: memref<1x256xi32, #tpu.memory_space<vmem>>, %arg9: memref<1x8x256xf32, #tpu.memory_space<vmem>>) attributes {dimension_semantics = [#tpu.dimension_semantics<parallel>, #tpu.dimension_semantics<arbitrary>], iteration_bounds = array<i64: 2, 1>, scalar_prefetch = 0 : i64, scratch_operands = 0 : i64, tpu.core_type = #tpu.core_type<tc>, window_params = [{transform_indices = @transform_0, window_bounds = array<i64: 1, 4, 256>}, {transform_indices = @transform_1, window_bounds = array<i64: 4, 9>}, {transform_indices = @transform_2, window_bounds = array<i64: 4, 1>}, {transform_indices = @transform_3, window_bounds = array<i64: 4, 4, 9>}, {transform_indices = @transform_4, window_bounds = array<i64: 8, 4>}, {pipeline_mode = #tpu.pipeline_mode<synchronous>, transform_indices = @transform_5, window_bounds = array<i64: 1, 256>}, {pipeline_mode = #tpu.pipeline_mode<synchronous>, transform_indices = @transform_6, window_bounds = array<i64: 1, 256>}, {transform_indices = @transform_7, window_bounds = array<i64: 1, 8, 256>}]} {
    %c0 = arith.constant 0 : index
    %c0_0 = arith.constant 0 : index
    %c0_1 = arith.constant 0 : index
    %0 = vector.load %arg2[%c0, %c0_0, %c0_1] : memref<1x4x256xf32, #tpu.memory_space<vmem>>, vector<1x4x256xf32>
    %1 = vector.shape_cast %0 : vector<1x4x256xf32> to vector<4x256xf32>
    %c0_2 = arith.constant 0 : index
    %c0_3 = arith.constant 0 : index
    %2 = vector.load %arg3[%c0_2, %c0_3] : memref<4x9xf32, #tpu.memory_space<vmem>>, vector<4x9xf32>
    %c0_4 = arith.constant 0 : index
    %c0_5 = arith.constant 0 : index
    %3 = vector.load %arg4[%c0_4, %c0_5] : memref<4x1xf32, #tpu.memory_space<vmem>>, vector<4x1xf32>
    %c0_6 = arith.constant 0 : index
    %c0_7 = arith.constant 0 : index
    %c0_8 = arith.constant 0 : index
    %4 = vector.load %arg5[%c0_6, %c0_7, %c0_8] : memref<4x4x9xf32, #tpu.memory_space<vmem>>, vector<4x4x9xf32>
    %c0_9 = arith.constant 0 : index
    %c0_10 = arith.constant 0 : index
    %5 = vector.load %arg6[%c0_9, %c0_10] : memref<8x4xf32, #tpu.memory_space<vmem>>, vector<8x4xf32>
    %c0_11 = arith.constant 0 : index
    %c0_12 = arith.constant 0 : index
    %6 = vector.load %arg7[%c0_11, %c0_12] : memref<1x256xi32, #tpu.memory_space<vmem>>, vector<1x256xi32>
    %c0_13 = arith.constant 0 : index
    %c0_14 = arith.constant 0 : index
    %7 = vector.load %arg8[%c0_13, %c0_14] : memref<1x256xi32, #tpu.memory_space<vmem>>, vector<1x256xi32>
    %c1_i32 = arith.constant 1 : i32
    %8 = vector.broadcast %c1_i32 : i32 to vector<1x256xi32>
    %9 = arith.andi %6, %8 : vector<1x256xi32>
    %c1_i32_15 = arith.constant 1 : i32
    %10 = vector.broadcast %c1_i32_15 : i32 to vector<1x256xi32>
    %11 = arith.cmpi eq, %9, %10 : vector<1x256xi32>
    %c1_i32_16 = arith.constant 1 : i32
    %12 = vector.broadcast %c1_i32_16 : i32 to vector<1x256xi32>
    %13 = arith.andi %7, %12 : vector<1x256xi32>
    %c1_i32_17 = arith.constant 1 : i32
    %14 = vector.broadcast %c1_i32_17 : i32 to vector<1x256xi32>
    %15 = arith.cmpi eq, %13, %14 : vector<1x256xi32>
    %cst = arith.constant 1.000000e+00 : f32
    %16 = vector.broadcast %cst : f32 to vector<1x256xf32>
    %cst_18 = arith.constant 0.000000e+00 : f32
    %17 = vector.broadcast %cst_18 : f32 to vector<1x256xf32>
    %18 = arith.subf %17, %16 : vector<1x256xf32>
    %19 = arith.select %11, %18, %16 : vector<1x256xi1>, vector<1x256xf32>
    %cst_19 = arith.constant 0.000000e+00 : f32
    %20 = vector.broadcast %cst_19 : f32 to vector<1x256xf32>
    %21 = arith.subf %20, %16 : vector<1x256xf32>
    %22 = arith.select %15, %21, %16 : vector<1x256xi1>, vector<1x256xf32>
    %23 = arith.mulf %19, %22 : vector<1x256xf32>
    %cst_20 = arith.constant 0.000000e+00 : f32
    %24 = vector.broadcast %cst_20 : f32 to vector<4x17xf32>
    %25 = vector.extract_strided_slice %1 {offsets = [0, 0], sizes = [4, 239], strides = [1, 1]} : vector<4x256xf32> to vector<4x239xf32>
    %26 = tpu.concatenate %24, %25 in 1 : vector<4x17xf32>, vector<4x239xf32> -> vector<4x256xf32>
    %c1_i32_21 = arith.constant 1 : i32
    %27 = vector.broadcast %c1_i32_21 : i32 to vector<1x256xi32>
    %28 = arith.cmpi sge, %6, %27 : vector<1x256xi32>
    %c17_i32 = arith.constant 17 : i32
    %29 = vector.broadcast %c17_i32 : i32 to vector<1x256xi32>
    %30 = arith.cmpi slt, %6, %29 : vector<1x256xi32>
    %31 = arith.andi %28, %30 : vector<1x256xi1>
    %c1_i32_22 = arith.constant 1 : i32
    %32 = vector.broadcast %c1_i32_22 : i32 to vector<1x256xi32>
    %33 = arith.cmpi sge, %7, %32 : vector<1x256xi32>
    %34 = arith.andi %31, %33 : vector<1x256xi1>
    %c17_i32_23 = arith.constant 17 : i32
    %35 = vector.broadcast %c17_i32_23 : i32 to vector<1x256xi32>
    %36 = arith.cmpi slt, %7, %35 : vector<1x256xi32>
    %37 = arith.andi %34, %36 : vector<1x256xi1>
    %cst_24 = arith.constant 0.000000e+00 : f32
    %38 = vector.shape_cast %37 : vector<1x256xi1> to vector<1x256xi1>
    %39 = vector.broadcast %38 : vector<1x256xi1> to vector<4x256xi1>
    %40 = vector.broadcast %cst_24 : f32 to vector<4x256xf32>
    %41 = arith.select %39, %26, %40 : vector<4x256xi1>, vector<4x256xf32>
    %cst_25 = arith.constant 0.000000e+00 : f32
    %42 = vector.broadcast %cst_25 : f32 to vector<4x16xf32>
    %43 = vector.extract_strided_slice %1 {offsets = [0, 0], sizes = [4, 240], strides = [1, 1]} : vector<4x256xf32> to vector<4x240xf32>
    %44 = tpu.concatenate %42, %43 in 1 : vector<4x16xf32>, vector<4x240xf32> -> vector<4x256xf32>
    %c1_i32_26 = arith.constant 1 : i32
    %45 = vector.broadcast %c1_i32_26 : i32 to vector<1x256xi32>
    %46 = arith.cmpi sge, %6, %45 : vector<1x256xi32>
    %c17_i32_27 = arith.constant 17 : i32
    %47 = vector.broadcast %c17_i32_27 : i32 to vector<1x256xi32>
    %48 = arith.cmpi slt, %6, %47 : vector<1x256xi32>
    %49 = arith.andi %46, %48 : vector<1x256xi1>
    %c0_i32 = arith.constant 0 : i32
    %50 = vector.broadcast %c0_i32 : i32 to vector<1x256xi32>
    %51 = arith.cmpi sge, %7, %50 : vector<1x256xi32>
    %52 = arith.andi %49, %51 : vector<1x256xi1>
    %c16_i32 = arith.constant 16 : i32
    %53 = vector.broadcast %c16_i32 : i32 to vector<1x256xi32>
    %54 = arith.cmpi slt, %7, %53 : vector<1x256xi32>
    %55 = arith.andi %52, %54 : vector<1x256xi1>
    %cst_28 = arith.constant 0.000000e+00 : f32
    %56 = vector.shape_cast %55 : vector<1x256xi1> to vector<1x256xi1>
    %57 = vector.broadcast %56 : vector<1x256xi1> to vector<4x256xi1>
    %58 = vector.broadcast %cst_28 : f32 to vector<4x256xf32>
    %59 = arith.select %57, %44, %58 : vector<4x256xi1>, vector<4x256xf32>
    %cst_29 = arith.constant 0.000000e+00 : f32
    %60 = vector.broadcast %cst_29 : f32 to vector<4x15xf32>
    %61 = vector.extract_strided_slice %1 {offsets = [0, 0], sizes = [4, 241], strides = [1, 1]} : vector<4x256xf32> to vector<4x241xf32>
    %62 = tpu.concatenate %60, %61 in 1 : vector<4x15xf32>, vector<4x241xf32> -> vector<4x256xf32>
    %c1_i32_30 = arith.constant 1 : i32
    %63 = vector.broadcast %c1_i32_30 : i32 to vector<1x256xi32>
    %64 = arith.cmpi sge, %6, %63 : vector<1x256xi32>
    %c17_i32_31 = arith.constant 17 : i32
    %65 = vector.broadcast %c17_i32_31 : i32 to vector<1x256xi32>
    %66 = arith.cmpi slt, %6, %65 : vector<1x256xi32>
    %67 = arith.andi %64, %66 : vector<1x256xi1>
    %c-1_i32 = arith.constant -1 : i32
    %68 = vector.broadcast %c-1_i32 : i32 to vector<1x256xi32>
    %69 = arith.cmpi sge, %7, %68 : vector<1x256xi32>
    %70 = arith.andi %67, %69 : vector<1x256xi1>
    %c15_i32 = arith.constant 15 : i32
    %71 = vector.broadcast %c15_i32 : i32 to vector<1x256xi32>
    %72 = arith.cmpi slt, %7, %71 : vector<1x256xi32>
    %73 = arith.andi %70, %72 : vector<1x256xi1>
    %cst_32 = arith.constant 0.000000e+00 : f32
    %74 = vector.shape_cast %73 : vector<1x256xi1> to vector<1x256xi1>
    %75 = vector.broadcast %74 : vector<1x256xi1> to vector<4x256xi1>
    %76 = vector.broadcast %cst_32 : f32 to vector<4x256xf32>
    %77 = arith.select %75, %62, %76 : vector<4x256xi1>, vector<4x256xf32>
    %cst_33 = arith.constant 0.000000e+00 : f32
    %78 = vector.broadcast %cst_33 : f32 to vector<4x1xf32>
    %79 = vector.extract_strided_slice %1 {offsets = [0, 0], sizes = [4, 255], strides = [1, 1]} : vector<4x256xf32> to vector<4x255xf32>
    %80 = tpu.concatenate %78, %79 in 1 : vector<4x1xf32>, vector<4x255xf32> -> vector<4x256xf32>
    %c0_i32_34 = arith.constant 0 : i32
    %81 = vector.broadcast %c0_i32_34 : i32 to vector<1x256xi32>
    %82 = arith.cmpi sge, %6, %81 : vector<1x256xi32>
    %c16_i32_35 = arith.constant 16 : i32
    %83 = vector.broadcast %c16_i32_35 : i32 to vector<1x256xi32>
    %84 = arith.cmpi slt, %6, %83 : vector<1x256xi32>
    %85 = arith.andi %82, %84 : vector<1x256xi1>
    %c1_i32_36 = arith.constant 1 : i32
    %86 = vector.broadcast %c1_i32_36 : i32 to vector<1x256xi32>
    %87 = arith.cmpi sge, %7, %86 : vector<1x256xi32>
    %88 = arith.andi %85, %87 : vector<1x256xi1>
    %c17_i32_37 = arith.constant 17 : i32
    %89 = vector.broadcast %c17_i32_37 : i32 to vector<1x256xi32>
    %90 = arith.cmpi slt, %7, %89 : vector<1x256xi32>
    %91 = arith.andi %88, %90 : vector<1x256xi1>
    %cst_38 = arith.constant 0.000000e+00 : f32
    %92 = vector.shape_cast %91 : vector<1x256xi1> to vector<1x256xi1>
    %93 = vector.broadcast %92 : vector<1x256xi1> to vector<4x256xi1>
    %94 = vector.broadcast %cst_38 : f32 to vector<4x256xf32>
    %95 = arith.select %93, %80, %94 : vector<4x256xi1>, vector<4x256xf32>
    %96 = vector.extract_strided_slice %1 {offsets = [0, 1], sizes = [4, 255], strides = [1, 1]} : vector<4x256xf32> to vector<4x255xf32>
    %cst_39 = arith.constant 0.000000e+00 : f32
    %97 = vector.broadcast %cst_39 : f32 to vector<4x1xf32>
    %98 = tpu.concatenate %96, %97 in 1 : vector<4x255xf32>, vector<4x1xf32> -> vector<4x256xf32>
    %c0_i32_40 = arith.constant 0 : i32
    %99 = vector.broadcast %c0_i32_40 : i32 to vector<1x256xi32>
    %100 = arith.cmpi sge, %6, %99 : vector<1x256xi32>
    %c16_i32_41 = arith.constant 16 : i32
    %101 = vector.broadcast %c16_i32_41 : i32 to vector<1x256xi32>
    %102 = arith.cmpi slt, %6, %101 : vector<1x256xi32>
    %103 = arith.andi %100, %102 : vector<1x256xi1>
    %c-1_i32_42 = arith.constant -1 : i32
    %104 = vector.broadcast %c-1_i32_42 : i32 to vector<1x256xi32>
    %105 = arith.cmpi sge, %7, %104 : vector<1x256xi32>
    %106 = arith.andi %103, %105 : vector<1x256xi1>
    %c15_i32_43 = arith.constant 15 : i32
    %107 = vector.broadcast %c15_i32_43 : i32 to vector<1x256xi32>
    %108 = arith.cmpi slt, %7, %107 : vector<1x256xi32>
    %109 = arith.andi %106, %108 : vector<1x256xi1>
    %cst_44 = arith.constant 0.000000e+00 : f32
    %110 = vector.shape_cast %109 : vector<1x256xi1> to vector<1x256xi1>
    %111 = vector.broadcast %110 : vector<1x256xi1> to vector<4x256xi1>
    %112 = vector.broadcast %cst_44 : f32 to vector<4x256xf32>
    %113 = arith.select %111, %98, %112 : vector<4x256xi1>, vector<4x256xf32>
    %114 = vector.extract_strided_slice %1 {offsets = [0, 15], sizes = [4, 241], strides = [1, 1]} : vector<4x256xf32> to vector<4x241xf32>
    %cst_45 = arith.constant 0.000000e+00 : f32
    %115 = vector.broadcast %cst_45 : f32 to vector<4x15xf32>
    %116 = tpu.concatenate %114, %115 in 1 : vector<4x241xf32>, vector<4x15xf32> -> vector<4x256xf32>
    %c-1_i32_46 = arith.constant -1 : i32
    %117 = vector.broadcast %c-1_i32_46 : i32 to vector<1x256xi32>
    %118 = arith.cmpi sge, %6, %117 : vector<1x256xi32>
    %c15_i32_47 = arith.constant 15 : i32
    %119 = vector.broadcast %c15_i32_47 : i32 to vector<1x256xi32>
    %120 = arith.cmpi slt, %6, %119 : vector<1x256xi32>
    %121 = arith.andi %118, %120 : vector<1x256xi1>
    %c1_i32_48 = arith.constant 1 : i32
    %122 = vector.broadcast %c1_i32_48 : i32 to vector<1x256xi32>
    %123 = arith.cmpi sge, %7, %122 : vector<1x256xi32>
    %124 = arith.andi %121, %123 : vector<1x256xi1>
    %c17_i32_49 = arith.constant 17 : i32
    %125 = vector.broadcast %c17_i32_49 : i32 to vector<1x256xi32>
    %126 = arith.cmpi slt, %7, %125 : vector<1x256xi32>
    %127 = arith.andi %124, %126 : vector<1x256xi1>
    %cst_50 = arith.constant 0.000000e+00 : f32
    %128 = vector.shape_cast %127 : vector<1x256xi1> to vector<1x256xi1>
    %129 = vector.broadcast %128 : vector<1x256xi1> to vector<4x256xi1>
    %130 = vector.broadcast %cst_50 : f32 to vector<4x256xf32>
    %131 = arith.select %129, %116, %130 : vector<4x256xi1>, vector<4x256xf32>
    %132 = vector.extract_strided_slice %1 {offsets = [0, 16], sizes = [4, 240], strides = [1, 1]} : vector<4x256xf32> to vector<4x240xf32>
    %cst_51 = arith.constant 0.000000e+00 : f32
    %133 = vector.broadcast %cst_51 : f32 to vector<4x16xf32>
    %134 = tpu.concatenate %132, %133 in 1 : vector<4x240xf32>, vector<4x16xf32> -> vector<4x256xf32>
    %c-1_i32_52 = arith.constant -1 : i32
    %135 = vector.broadcast %c-1_i32_52 : i32 to vector<1x256xi32>
    %136 = arith.cmpi sge, %6, %135 : vector<1x256xi32>
    %c15_i32_53 = arith.constant 15 : i32
    %137 = vector.broadcast %c15_i32_53 : i32 to vector<1x256xi32>
    %138 = arith.cmpi slt, %6, %137 : vector<1x256xi32>
    %139 = arith.andi %136, %138 : vector<1x256xi1>
    %c0_i32_54 = arith.constant 0 : i32
    %140 = vector.broadcast %c0_i32_54 : i32 to vector<1x256xi32>
    %141 = arith.cmpi sge, %7, %140 : vector<1x256xi32>
    %142 = arith.andi %139, %141 : vector<1x256xi1>
    %c16_i32_55 = arith.constant 16 : i32
    %143 = vector.broadcast %c16_i32_55 : i32 to vector<1x256xi32>
    %144 = arith.cmpi slt, %7, %143 : vector<1x256xi32>
    %145 = arith.andi %142, %144 : vector<1x256xi1>
    %cst_56 = arith.constant 0.000000e+00 : f32
    %146 = vector.shape_cast %145 : vector<1x256xi1> to vector<1x256xi1>
    %147 = vector.broadcast %146 : vector<1x256xi1> to vector<4x256xi1>
    %148 = vector.broadcast %cst_56 : f32 to vector<4x256xf32>
    %149 = arith.select %147, %134, %148 : vector<4x256xi1>, vector<4x256xf32>
    %150 = vector.extract_strided_slice %1 {offsets = [0, 17], sizes = [4, 239], strides = [1, 1]} : vector<4x256xf32> to vector<4x239xf32>
    %cst_57 = arith.constant 0.000000e+00 : f32
    %151 = vector.broadcast %cst_57 : f32 to vector<4x17xf32>
    %152 = tpu.concatenate %150, %151 in 1 : vector<4x239xf32>, vector<4x17xf32> -> vector<4x256xf32>
    %c-1_i32_58 = arith.constant -1 : i32
    %153 = vector.broadcast %c-1_i32_58 : i32 to vector<1x256xi32>
    %154 = arith.cmpi sge, %6, %153 : vector<1x256xi32>
    %c15_i32_59 = arith.constant 15 : i32
    %155 = vector.broadcast %c15_i32_59 : i32 to vector<1x256xi32>
    %156 = arith.cmpi slt, %6, %155 : vector<1x256xi32>
    %157 = arith.andi %154, %156 : vector<1x256xi1>
    %c-1_i32_60 = arith.constant -1 : i32
    %158 = vector.broadcast %c-1_i32_60 : i32 to vector<1x256xi32>
    %159 = arith.cmpi sge, %7, %158 : vector<1x256xi32>
    %160 = arith.andi %157, %159 : vector<1x256xi1>
    %c15_i32_61 = arith.constant 15 : i32
    %161 = vector.broadcast %c15_i32_61 : i32 to vector<1x256xi32>
    %162 = arith.cmpi slt, %7, %161 : vector<1x256xi32>
    %163 = arith.andi %160, %162 : vector<1x256xi1>
    %cst_62 = arith.constant 0.000000e+00 : f32
    %164 = vector.shape_cast %163 : vector<1x256xi1> to vector<1x256xi1>
    %165 = vector.broadcast %164 : vector<1x256xi1> to vector<4x256xi1>
    %166 = vector.broadcast %cst_62 : f32 to vector<4x256xf32>
    %167 = arith.select %165, %152, %166 : vector<4x256xi1>, vector<4x256xf32>
    %168 = vector.shape_cast %15 : vector<1x256xi1> to vector<1x256xi1>
    %169 = vector.broadcast %168 : vector<1x256xi1> to vector<4x256xi1>
    %170 = arith.select %169, %95, %113 : vector<4x256xi1>, vector<4x256xf32>
    %171 = vector.shape_cast %11 : vector<1x256xi1> to vector<1x256xi1>
    %172 = vector.broadcast %171 : vector<1x256xi1> to vector<4x256xi1>
    %173 = arith.select %172, %59, %149 : vector<4x256xi1>, vector<4x256xf32>
    %cst_63 = arith.constant 0.000000e+00 : f32
    %174 = vector.broadcast %cst_63 : f32 to vector<4x1xf32>
    %175 = vector.extract_strided_slice %173 {offsets = [0, 0], sizes = [4, 255], strides = [1, 1]} : vector<4x256xf32> to vector<4x255xf32>
    %176 = tpu.concatenate %174, %175 in 1 : vector<4x1xf32>, vector<4x255xf32> -> vector<4x256xf32>
    %177 = vector.extract_strided_slice %173 {offsets = [0, 1], sizes = [4, 255], strides = [1, 1]} : vector<4x256xf32> to vector<4x255xf32>
    %cst_64 = arith.constant 0.000000e+00 : f32
    %178 = vector.broadcast %cst_64 : f32 to vector<4x1xf32>
    %179 = tpu.concatenate %177, %178 in 1 : vector<4x255xf32>, vector<4x1xf32> -> vector<4x256xf32>
    %180 = vector.shape_cast %15 : vector<1x256xi1> to vector<1x256xi1>
    %181 = vector.broadcast %180 : vector<1x256xi1> to vector<4x256xi1>
    %182 = arith.select %181, %176, %179 : vector<4x256xi1>, vector<4x256xf32>
    %183 = vector.broadcast %19 : vector<1x256xf32> to vector<4x256xf32>
    %184 = arith.mulf %183, %170 : vector<4x256xf32>
    %185 = arith.addf %1, %184 : vector<4x256xf32>
    %186 = vector.broadcast %22 : vector<1x256xf32> to vector<4x256xf32>
    %187 = arith.mulf %186, %173 : vector<4x256xf32>
    %188 = arith.addf %185, %187 : vector<4x256xf32>
    %189 = vector.broadcast %23 : vector<1x256xf32> to vector<4x256xf32>
    %190 = arith.mulf %189, %182 : vector<4x256xf32>
    %191 = arith.addf %188, %190 : vector<4x256xf32>
    %cst_65 = arith.constant 5.000000e-01 : f32
    %192 = vector.broadcast %cst_65 : f32 to vector<4x256xf32>
    %193 = arith.mulf %192, %191 : vector<4x256xf32>
    %cst_66 = arith.constant 0.000000e+00 : f32
    %194 = vector.broadcast %cst_66 : f32 to vector<4x34xf32>
    %195 = vector.extract_strided_slice %193 {offsets = [0, 0], sizes = [4, 222], strides = [1, 1]} : vector<4x256xf32> to vector<4x222xf32>
    %196 = tpu.concatenate %194, %195 in 1 : vector<4x34xf32>, vector<4x222xf32> -> vector<4x256xf32>
    %c2_i32 = arith.constant 2 : i32
    %197 = vector.broadcast %c2_i32 : i32 to vector<1x256xi32>
    %198 = arith.cmpi sge, %6, %197 : vector<1x256xi32>
    %c18_i32 = arith.constant 18 : i32
    %199 = vector.broadcast %c18_i32 : i32 to vector<1x256xi32>
    %200 = arith.cmpi slt, %6, %199 : vector<1x256xi32>
    %201 = arith.andi %198, %200 : vector<1x256xi1>
    %c2_i32_67 = arith.constant 2 : i32
    %202 = vector.broadcast %c2_i32_67 : i32 to vector<1x256xi32>
    %203 = arith.cmpi sge, %7, %202 : vector<1x256xi32>
    %204 = arith.andi %201, %203 : vector<1x256xi1>
    %c18_i32_68 = arith.constant 18 : i32
    %205 = vector.broadcast %c18_i32_68 : i32 to vector<1x256xi32>
    %206 = arith.cmpi slt, %7, %205 : vector<1x256xi32>
    %207 = arith.andi %204, %206 : vector<1x256xi1>
    %cst_69 = arith.constant 0.000000e+00 : f32
    %208 = vector.shape_cast %207 : vector<1x256xi1> to vector<1x256xi1>
    %209 = vector.broadcast %208 : vector<1x256xi1> to vector<4x256xi1>
    %210 = vector.broadcast %cst_69 : f32 to vector<4x256xf32>
    %211 = arith.select %209, %196, %210 : vector<4x256xi1>, vector<4x256xf32>
    %cst_70 = arith.constant 0.000000e+00 : f32
    %212 = vector.broadcast %cst_70 : f32 to vector<4x32xf32>
    %213 = vector.extract_strided_slice %193 {offsets = [0, 0], sizes = [4, 224], strides = [1, 1]} : vector<4x256xf32> to vector<4x224xf32>
    %214 = tpu.concatenate %212, %213 in 1 : vector<4x32xf32>, vector<4x224xf32> -> vector<4x256xf32>
    %c2_i32_71 = arith.constant 2 : i32
    %215 = vector.broadcast %c2_i32_71 : i32 to vector<1x256xi32>
    %216 = arith.cmpi sge, %6, %215 : vector<1x256xi32>
    %c18_i32_72 = arith.constant 18 : i32
    %217 = vector.broadcast %c18_i32_72 : i32 to vector<1x256xi32>
    %218 = arith.cmpi slt, %6, %217 : vector<1x256xi32>
    %219 = arith.andi %216, %218 : vector<1x256xi1>
    %c0_i32_73 = arith.constant 0 : i32
    %220 = vector.broadcast %c0_i32_73 : i32 to vector<1x256xi32>
    %221 = arith.cmpi sge, %7, %220 : vector<1x256xi32>
    %222 = arith.andi %219, %221 : vector<1x256xi1>
    %c16_i32_74 = arith.constant 16 : i32
    %223 = vector.broadcast %c16_i32_74 : i32 to vector<1x256xi32>
    %224 = arith.cmpi slt, %7, %223 : vector<1x256xi32>
    %225 = arith.andi %222, %224 : vector<1x256xi1>
    %cst_75 = arith.constant 0.000000e+00 : f32
    %226 = vector.shape_cast %225 : vector<1x256xi1> to vector<1x256xi1>
    %227 = vector.broadcast %226 : vector<1x256xi1> to vector<4x256xi1>
    %228 = vector.broadcast %cst_75 : f32 to vector<4x256xf32>
    %229 = arith.select %227, %214, %228 : vector<4x256xi1>, vector<4x256xf32>
    %cst_76 = arith.constant 0.000000e+00 : f32
    %230 = vector.broadcast %cst_76 : f32 to vector<4x30xf32>
    %231 = vector.extract_strided_slice %193 {offsets = [0, 0], sizes = [4, 226], strides = [1, 1]} : vector<4x256xf32> to vector<4x226xf32>
    %232 = tpu.concatenate %230, %231 in 1 : vector<4x30xf32>, vector<4x226xf32> -> vector<4x256xf32>
    %c2_i32_77 = arith.constant 2 : i32
    %233 = vector.broadcast %c2_i32_77 : i32 to vector<1x256xi32>
    %234 = arith.cmpi sge, %6, %233 : vector<1x256xi32>
    %c18_i32_78 = arith.constant 18 : i32
    %235 = vector.broadcast %c18_i32_78 : i32 to vector<1x256xi32>
    %236 = arith.cmpi slt, %6, %235 : vector<1x256xi32>
    %237 = arith.andi %234, %236 : vector<1x256xi1>
    %c-2_i32 = arith.constant -2 : i32
    %238 = vector.broadcast %c-2_i32 : i32 to vector<1x256xi32>
    %239 = arith.cmpi sge, %7, %238 : vector<1x256xi32>
    %240 = arith.andi %237, %239 : vector<1x256xi1>
    %c14_i32 = arith.constant 14 : i32
    %241 = vector.broadcast %c14_i32 : i32 to vector<1x256xi32>
    %242 = arith.cmpi slt, %7, %241 : vector<1x256xi32>
    %243 = arith.andi %240, %242 : vector<1x256xi1>
    %cst_79 = arith.constant 0.000000e+00 : f32
    %244 = vector.shape_cast %243 : vector<1x256xi1> to vector<1x256xi1>
    %245 = vector.broadcast %244 : vector<1x256xi1> to vector<4x256xi1>
    %246 = vector.broadcast %cst_79 : f32 to vector<4x256xf32>
    %247 = arith.select %245, %232, %246 : vector<4x256xi1>, vector<4x256xf32>
    %cst_80 = arith.constant 0.000000e+00 : f32
    %248 = vector.broadcast %cst_80 : f32 to vector<4x2xf32>
    %249 = vector.extract_strided_slice %193 {offsets = [0, 0], sizes = [4, 254], strides = [1, 1]} : vector<4x256xf32> to vector<4x254xf32>
    %250 = tpu.concatenate %248, %249 in 1 : vector<4x2xf32>, vector<4x254xf32> -> vector<4x256xf32>
    %c0_i32_81 = arith.constant 0 : i32
    %251 = vector.broadcast %c0_i32_81 : i32 to vector<1x256xi32>
    %252 = arith.cmpi sge, %6, %251 : vector<1x256xi32>
    %c16_i32_82 = arith.constant 16 : i32
    %253 = vector.broadcast %c16_i32_82 : i32 to vector<1x256xi32>
    %254 = arith.cmpi slt, %6, %253 : vector<1x256xi32>
    %255 = arith.andi %252, %254 : vector<1x256xi1>
    %c2_i32_83 = arith.constant 2 : i32
    %256 = vector.broadcast %c2_i32_83 : i32 to vector<1x256xi32>
    %257 = arith.cmpi sge, %7, %256 : vector<1x256xi32>
    %258 = arith.andi %255, %257 : vector<1x256xi1>
    %c18_i32_84 = arith.constant 18 : i32
    %259 = vector.broadcast %c18_i32_84 : i32 to vector<1x256xi32>
    %260 = arith.cmpi slt, %7, %259 : vector<1x256xi32>
    %261 = arith.andi %258, %260 : vector<1x256xi1>
    %cst_85 = arith.constant 0.000000e+00 : f32
    %262 = vector.shape_cast %261 : vector<1x256xi1> to vector<1x256xi1>
    %263 = vector.broadcast %262 : vector<1x256xi1> to vector<4x256xi1>
    %264 = vector.broadcast %cst_85 : f32 to vector<4x256xf32>
    %265 = arith.select %263, %250, %264 : vector<4x256xi1>, vector<4x256xf32>
    %266 = vector.extract_strided_slice %193 {offsets = [0, 2], sizes = [4, 254], strides = [1, 1]} : vector<4x256xf32> to vector<4x254xf32>
    %cst_86 = arith.constant 0.000000e+00 : f32
    %267 = vector.broadcast %cst_86 : f32 to vector<4x2xf32>
    %268 = tpu.concatenate %266, %267 in 1 : vector<4x254xf32>, vector<4x2xf32> -> vector<4x256xf32>
    %c0_i32_87 = arith.constant 0 : i32
    %269 = vector.broadcast %c0_i32_87 : i32 to vector<1x256xi32>
    %270 = arith.cmpi sge, %6, %269 : vector<1x256xi32>
    %c16_i32_88 = arith.constant 16 : i32
    %271 = vector.broadcast %c16_i32_88 : i32 to vector<1x256xi32>
    %272 = arith.cmpi slt, %6, %271 : vector<1x256xi32>
    %273 = arith.andi %270, %272 : vector<1x256xi1>
    %c-2_i32_89 = arith.constant -2 : i32
    %274 = vector.broadcast %c-2_i32_89 : i32 to vector<1x256xi32>
    %275 = arith.cmpi sge, %7, %274 : vector<1x256xi32>
    %276 = arith.andi %273, %275 : vector<1x256xi1>
    %c14_i32_90 = arith.constant 14 : i32
    %277 = vector.broadcast %c14_i32_90 : i32 to vector<1x256xi32>
    %278 = arith.cmpi slt, %7, %277 : vector<1x256xi32>
    %279 = arith.andi %276, %278 : vector<1x256xi1>
    %cst_91 = arith.constant 0.000000e+00 : f32
    %280 = vector.shape_cast %279 : vector<1x256xi1> to vector<1x256xi1>
    %281 = vector.broadcast %280 : vector<1x256xi1> to vector<4x256xi1>
    %282 = vector.broadcast %cst_91 : f32 to vector<4x256xf32>
    %283 = arith.select %281, %268, %282 : vector<4x256xi1>, vector<4x256xf32>
    %284 = vector.extract_strided_slice %193 {offsets = [0, 30], sizes = [4, 226], strides = [1, 1]} : vector<4x256xf32> to vector<4x226xf32>
    %cst_92 = arith.constant 0.000000e+00 : f32
    %285 = vector.broadcast %cst_92 : f32 to vector<4x30xf32>
    %286 = tpu.concatenate %284, %285 in 1 : vector<4x226xf32>, vector<4x30xf32> -> vector<4x256xf32>
    %c-2_i32_93 = arith.constant -2 : i32
    %287 = vector.broadcast %c-2_i32_93 : i32 to vector<1x256xi32>
    %288 = arith.cmpi sge, %6, %287 : vector<1x256xi32>
    %c14_i32_94 = arith.constant 14 : i32
    %289 = vector.broadcast %c14_i32_94 : i32 to vector<1x256xi32>
    %290 = arith.cmpi slt, %6, %289 : vector<1x256xi32>
    %291 = arith.andi %288, %290 : vector<1x256xi1>
    %c2_i32_95 = arith.constant 2 : i32
    %292 = vector.broadcast %c2_i32_95 : i32 to vector<1x256xi32>
    %293 = arith.cmpi sge, %7, %292 : vector<1x256xi32>
    %294 = arith.andi %291, %293 : vector<1x256xi1>
    %c18_i32_96 = arith.constant 18 : i32
    %295 = vector.broadcast %c18_i32_96 : i32 to vector<1x256xi32>
    %296 = arith.cmpi slt, %7, %295 : vector<1x256xi32>
    %297 = arith.andi %294, %296 : vector<1x256xi1>
    %cst_97 = arith.constant 0.000000e+00 : f32
    %298 = vector.shape_cast %297 : vector<1x256xi1> to vector<1x256xi1>
    %299 = vector.broadcast %298 : vector<1x256xi1> to vector<4x256xi1>
    %300 = vector.broadcast %cst_97 : f32 to vector<4x256xf32>
    %301 = arith.select %299, %286, %300 : vector<4x256xi1>, vector<4x256xf32>
    %302 = vector.extract_strided_slice %193 {offsets = [0, 32], sizes = [4, 224], strides = [1, 1]} : vector<4x256xf32> to vector<4x224xf32>
    %cst_98 = arith.constant 0.000000e+00 : f32
    %303 = vector.broadcast %cst_98 : f32 to vector<4x32xf32>
    %304 = tpu.concatenate %302, %303 in 1 : vector<4x224xf32>, vector<4x32xf32> -> vector<4x256xf32>
    %c-2_i32_99 = arith.constant -2 : i32
    %305 = vector.broadcast %c-2_i32_99 : i32 to vector<1x256xi32>
    %306 = arith.cmpi sge, %6, %305 : vector<1x256xi32>
    %c14_i32_100 = arith.constant 14 : i32
    %307 = vector.broadcast %c14_i32_100 : i32 to vector<1x256xi32>
    %308 = arith.cmpi slt, %6, %307 : vector<1x256xi32>
    %309 = arith.andi %306, %308 : vector<1x256xi1>
    %c0_i32_101 = arith.constant 0 : i32
    %310 = vector.broadcast %c0_i32_101 : i32 to vector<1x256xi32>
    %311 = arith.cmpi sge, %7, %310 : vector<1x256xi32>
    %312 = arith.andi %309, %311 : vector<1x256xi1>
    %c16_i32_102 = arith.constant 16 : i32
    %313 = vector.broadcast %c16_i32_102 : i32 to vector<1x256xi32>
    %314 = arith.cmpi slt, %7, %313 : vector<1x256xi32>
    %315 = arith.andi %312, %314 : vector<1x256xi1>
    %cst_103 = arith.constant 0.000000e+00 : f32
    %316 = vector.shape_cast %315 : vector<1x256xi1> to vector<1x256xi1>
    %317 = vector.broadcast %316 : vector<1x256xi1> to vector<4x256xi1>
    %318 = vector.broadcast %cst_103 : f32 to vector<4x256xf32>
    %319 = arith.select %317, %304, %318 : vector<4x256xi1>, vector<4x256xf32>
    %320 = vector.extract_strided_slice %193 {offsets = [0, 34], sizes = [4, 222], strides = [1, 1]} : vector<4x256xf32> to vector<4x222xf32>
    %cst_104 = arith.constant 0.000000e+00 : f32
    %321 = vector.broadcast %cst_104 : f32 to vector<4x34xf32>
    %322 = tpu.concatenate %320, %321 in 1 : vector<4x222xf32>, vector<4x34xf32> -> vector<4x256xf32>
    %c-2_i32_105 = arith.constant -2 : i32
    %323 = vector.broadcast %c-2_i32_105 : i32 to vector<1x256xi32>
    %324 = arith.cmpi sge, %6, %323 : vector<1x256xi32>
    %c14_i32_106 = arith.constant 14 : i32
    %325 = vector.broadcast %c14_i32_106 : i32 to vector<1x256xi32>
    %326 = arith.cmpi slt, %6, %325 : vector<1x256xi32>
    %327 = arith.andi %324, %326 : vector<1x256xi1>
    %c-2_i32_107 = arith.constant -2 : i32
    %328 = vector.broadcast %c-2_i32_107 : i32 to vector<1x256xi32>
    %329 = arith.cmpi sge, %7, %328 : vector<1x256xi32>
    %330 = arith.andi %327, %329 : vector<1x256xi1>
    %c14_i32_108 = arith.constant 14 : i32
    %331 = vector.broadcast %c14_i32_108 : i32 to vector<1x256xi32>
    %332 = arith.cmpi slt, %7, %331 : vector<1x256xi32>
    %333 = arith.andi %330, %332 : vector<1x256xi1>
    %cst_109 = arith.constant 0.000000e+00 : f32
    %334 = vector.shape_cast %333 : vector<1x256xi1> to vector<1x256xi1>
    %335 = vector.broadcast %334 : vector<1x256xi1> to vector<4x256xi1>
    %336 = vector.broadcast %cst_109 : f32 to vector<4x256xf32>
    %337 = arith.select %335, %322, %336 : vector<4x256xi1>, vector<4x256xf32>
    %cst_110 = arith.constant dense<true> : vector<1x256xi1>
    %338 = arith.xori %11, %cst_110 : vector<1x256xi1>
    %cst_111 = arith.constant dense<true> : vector<1x256xi1>
    %339 = arith.xori %15, %cst_111 : vector<1x256xi1>
    %340 = arith.andi %338, %339 : vector<1x256xi1>
    %cst_112 = arith.constant 0.000000e+00 : f32
    %341 = vector.broadcast %cst_112 : f32 to vector<1x256xf32>
    %342 = arith.select %340, %16, %341 : vector<1x256xi1>, vector<1x256xf32>
    %cst_113 = arith.constant dense<true> : vector<1x256xi1>
    %343 = arith.xori %11, %cst_113 : vector<1x256xi1>
    %344 = arith.andi %343, %15 : vector<1x256xi1>
    %cst_114 = arith.constant 0.000000e+00 : f32
    %345 = vector.broadcast %cst_114 : f32 to vector<1x256xf32>
    %346 = arith.select %344, %16, %345 : vector<1x256xi1>, vector<1x256xf32>
    %cst_115 = arith.constant dense<true> : vector<1x256xi1>
    %347 = arith.xori %15, %cst_115 : vector<1x256xi1>
    %348 = arith.andi %11, %347 : vector<1x256xi1>
    %cst_116 = arith.constant 0.000000e+00 : f32
    %349 = vector.broadcast %cst_116 : f32 to vector<1x256xf32>
    %350 = arith.select %348, %16, %349 : vector<1x256xi1>, vector<1x256xf32>
    %351 = arith.andi %11, %15 : vector<1x256xi1>
    %cst_117 = arith.constant 0.000000e+00 : f32
    %352 = vector.broadcast %cst_117 : f32 to vector<1x256xf32>
    %353 = arith.select %351, %16, %352 : vector<1x256xi1>, vector<1x256xf32>
    %cst_118 = arith.constant 0.000000e+00 : f32
    %354 = vector.broadcast %cst_118 : f32 to vector<4x256xf32>
    %cst_119 = arith.constant 0.000000e+00 : f32
    %355 = vector.broadcast %cst_119 : f32 to vector<4x256xf32>
    %356 = vector.extract_strided_slice %4 {offsets = [0, 0, 0], sizes = [1, 4, 1], strides = [1, 1, 1]} : vector<4x4x9xf32> to vector<1x4x1xf32>
    %357 = vector.shape_cast %356 : vector<1x4x1xf32> to vector<4x1xf32>
    %358 = vector.broadcast %357 : vector<4x1xf32> to vector<4x256xf32>
    %359 = arith.mulf %358, %211 : vector<4x256xf32>
    %360 = arith.addf %355, %359 : vector<4x256xf32>
    %361 = vector.extract_strided_slice %4 {offsets = [0, 0, 1], sizes = [1, 4, 1], strides = [1, 1, 1]} : vector<4x4x9xf32> to vector<1x4x1xf32>
    %362 = vector.shape_cast %361 : vector<1x4x1xf32> to vector<4x1xf32>
    %363 = vector.broadcast %362 : vector<4x1xf32> to vector<4x256xf32>
    %364 = arith.mulf %363, %229 : vector<4x256xf32>
    %365 = arith.addf %360, %364 : vector<4x256xf32>
    %366 = vector.extract_strided_slice %4 {offsets = [0, 0, 2], sizes = [1, 4, 1], strides = [1, 1, 1]} : vector<4x4x9xf32> to vector<1x4x1xf32>
    %367 = vector.shape_cast %366 : vector<1x4x1xf32> to vector<4x1xf32>
    %368 = vector.broadcast %367 : vector<4x1xf32> to vector<4x256xf32>
    %369 = arith.mulf %368, %247 : vector<4x256xf32>
    %370 = arith.addf %365, %369 : vector<4x256xf32>
    %371 = vector.extract_strided_slice %4 {offsets = [0, 0, 3], sizes = [1, 4, 1], strides = [1, 1, 1]} : vector<4x4x9xf32> to vector<1x4x1xf32>
    %372 = vector.shape_cast %371 : vector<1x4x1xf32> to vector<4x1xf32>
    %373 = vector.broadcast %372 : vector<4x1xf32> to vector<4x256xf32>
    %374 = arith.mulf %373, %265 : vector<4x256xf32>
    %375 = arith.addf %370, %374 : vector<4x256xf32>
    %376 = vector.extract_strided_slice %4 {offsets = [0, 0, 4], sizes = [1, 4, 1], strides = [1, 1, 1]} : vector<4x4x9xf32> to vector<1x4x1xf32>
    %377 = vector.shape_cast %376 : vector<1x4x1xf32> to vector<4x1xf32>
    %378 = vector.broadcast %377 : vector<4x1xf32> to vector<4x256xf32>
    %379 = arith.mulf %378, %193 : vector<4x256xf32>
    %380 = arith.addf %375, %379 : vector<4x256xf32>
    %381 = vector.extract_strided_slice %4 {offsets = [0, 0, 5], sizes = [1, 4, 1], strides = [1, 1, 1]} : vector<4x4x9xf32> to vector<1x4x1xf32>
    %382 = vector.shape_cast %381 : vector<1x4x1xf32> to vector<4x1xf32>
    %383 = vector.broadcast %382 : vector<4x1xf32> to vector<4x256xf32>
    %384 = arith.mulf %383, %283 : vector<4x256xf32>
    %385 = arith.addf %380, %384 : vector<4x256xf32>
    %386 = vector.extract_strided_slice %4 {offsets = [0, 0, 6], sizes = [1, 4, 1], strides = [1, 1, 1]} : vector<4x4x9xf32> to vector<1x4x1xf32>
    %387 = vector.shape_cast %386 : vector<1x4x1xf32> to vector<4x1xf32>
    %388 = vector.broadcast %387 : vector<4x1xf32> to vector<4x256xf32>
    %389 = arith.mulf %388, %301 : vector<4x256xf32>
    %390 = arith.addf %385, %389 : vector<4x256xf32>
    %391 = vector.extract_strided_slice %4 {offsets = [0, 0, 7], sizes = [1, 4, 1], strides = [1, 1, 1]} : vector<4x4x9xf32> to vector<1x4x1xf32>
    %392 = vector.shape_cast %391 : vector<1x4x1xf32> to vector<4x1xf32>
    %393 = vector.broadcast %392 : vector<4x1xf32> to vector<4x256xf32>
    %394 = arith.mulf %393, %319 : vector<4x256xf32>
    %395 = arith.addf %390, %394 : vector<4x256xf32>
    %396 = vector.extract_strided_slice %4 {offsets = [0, 0, 8], sizes = [1, 4, 1], strides = [1, 1, 1]} : vector<4x4x9xf32> to vector<1x4x1xf32>
    %397 = vector.shape_cast %396 : vector<1x4x1xf32> to vector<4x1xf32>
    %398 = vector.broadcast %397 : vector<4x1xf32> to vector<4x256xf32>
    %399 = arith.mulf %398, %337 : vector<4x256xf32>
    %400 = arith.addf %395, %399 : vector<4x256xf32>
    %401 = vector.broadcast %342 : vector<1x256xf32> to vector<4x256xf32>
    %402 = arith.mulf %401, %400 : vector<4x256xf32>
    %403 = arith.addf %354, %402 : vector<4x256xf32>
    %cst_120 = arith.constant 0.000000e+00 : f32
    %404 = vector.broadcast %cst_120 : f32 to vector<4x256xf32>
    %405 = vector.extract_strided_slice %4 {offsets = [1, 0, 0], sizes = [1, 4, 1], strides = [1, 1, 1]} : vector<4x4x9xf32> to vector<1x4x1xf32>
    %406 = vector.shape_cast %405 : vector<1x4x1xf32> to vector<4x1xf32>
    %407 = vector.broadcast %406 : vector<4x1xf32> to vector<4x256xf32>
    %408 = arith.mulf %407, %211 : vector<4x256xf32>
    %409 = arith.addf %404, %408 : vector<4x256xf32>
    %410 = vector.extract_strided_slice %4 {offsets = [1, 0, 1], sizes = [1, 4, 1], strides = [1, 1, 1]} : vector<4x4x9xf32> to vector<1x4x1xf32>
    %411 = vector.shape_cast %410 : vector<1x4x1xf32> to vector<4x1xf32>
    %412 = vector.broadcast %411 : vector<4x1xf32> to vector<4x256xf32>
    %413 = arith.mulf %412, %229 : vector<4x256xf32>
    %414 = arith.addf %409, %413 : vector<4x256xf32>
    %415 = vector.extract_strided_slice %4 {offsets = [1, 0, 2], sizes = [1, 4, 1], strides = [1, 1, 1]} : vector<4x4x9xf32> to vector<1x4x1xf32>
    %416 = vector.shape_cast %415 : vector<1x4x1xf32> to vector<4x1xf32>
    %417 = vector.broadcast %416 : vector<4x1xf32> to vector<4x256xf32>
    %418 = arith.mulf %417, %247 : vector<4x256xf32>
    %419 = arith.addf %414, %418 : vector<4x256xf32>
    %420 = vector.extract_strided_slice %4 {offsets = [1, 0, 3], sizes = [1, 4, 1], strides = [1, 1, 1]} : vector<4x4x9xf32> to vector<1x4x1xf32>
    %421 = vector.shape_cast %420 : vector<1x4x1xf32> to vector<4x1xf32>
    %422 = vector.broadcast %421 : vector<4x1xf32> to vector<4x256xf32>
    %423 = arith.mulf %422, %265 : vector<4x256xf32>
    %424 = arith.addf %419, %423 : vector<4x256xf32>
    %425 = vector.extract_strided_slice %4 {offsets = [1, 0, 4], sizes = [1, 4, 1], strides = [1, 1, 1]} : vector<4x4x9xf32> to vector<1x4x1xf32>
    %426 = vector.shape_cast %425 : vector<1x4x1xf32> to vector<4x1xf32>
    %427 = vector.broadcast %426 : vector<4x1xf32> to vector<4x256xf32>
    %428 = arith.mulf %427, %193 : vector<4x256xf32>
    %429 = arith.addf %424, %428 : vector<4x256xf32>
    %430 = vector.extract_strided_slice %4 {offsets = [1, 0, 5], sizes = [1, 4, 1], strides = [1, 1, 1]} : vector<4x4x9xf32> to vector<1x4x1xf32>
    %431 = vector.shape_cast %430 : vector<1x4x1xf32> to vector<4x1xf32>
    %432 = vector.broadcast %431 : vector<4x1xf32> to vector<4x256xf32>
    %433 = arith.mulf %432, %283 : vector<4x256xf32>
    %434 = arith.addf %429, %433 : vector<4x256xf32>
    %435 = vector.extract_strided_slice %4 {offsets = [1, 0, 6], sizes = [1, 4, 1], strides = [1, 1, 1]} : vector<4x4x9xf32> to vector<1x4x1xf32>
    %436 = vector.shape_cast %435 : vector<1x4x1xf32> to vector<4x1xf32>
    %437 = vector.broadcast %436 : vector<4x1xf32> to vector<4x256xf32>
    %438 = arith.mulf %437, %301 : vector<4x256xf32>
    %439 = arith.addf %434, %438 : vector<4x256xf32>
    %440 = vector.extract_strided_slice %4 {offsets = [1, 0, 7], sizes = [1, 4, 1], strides = [1, 1, 1]} : vector<4x4x9xf32> to vector<1x4x1xf32>
    %441 = vector.shape_cast %440 : vector<1x4x1xf32> to vector<4x1xf32>
    %442 = vector.broadcast %441 : vector<4x1xf32> to vector<4x256xf32>
    %443 = arith.mulf %442, %319 : vector<4x256xf32>
    %444 = arith.addf %439, %443 : vector<4x256xf32>
    %445 = vector.extract_strided_slice %4 {offsets = [1, 0, 8], sizes = [1, 4, 1], strides = [1, 1, 1]} : vector<4x4x9xf32> to vector<1x4x1xf32>
    %446 = vector.shape_cast %445 : vector<1x4x1xf32> to vector<4x1xf32>
    %447 = vector.broadcast %446 : vector<4x1xf32> to vector<4x256xf32>
    %448 = arith.mulf %447, %337 : vector<4x256xf32>
    %449 = arith.addf %444, %448 : vector<4x256xf32>
    %450 = vector.broadcast %346 : vector<1x256xf32> to vector<4x256xf32>
    %451 = arith.mulf %450, %449 : vector<4x256xf32>
    %452 = arith.addf %403, %451 : vector<4x256xf32>
    %cst_121 = arith.constant 0.000000e+00 : f32
    %453 = vector.broadcast %cst_121 : f32 to vector<4x256xf32>
    %454 = vector.extract_strided_slice %4 {offsets = [2, 0, 0], sizes = [1, 4, 1], strides = [1, 1, 1]} : vector<4x4x9xf32> to vector<1x4x1xf32>
    %455 = vector.shape_cast %454 : vector<1x4x1xf32> to vector<4x1xf32>
    %456 = vector.broadcast %455 : vector<4x1xf32> to vector<4x256xf32>
    %457 = arith.mulf %456, %211 : vector<4x256xf32>
    %458 = arith.addf %453, %457 : vector<4x256xf32>
    %459 = vector.extract_strided_slice %4 {offsets = [2, 0, 1], sizes = [1, 4, 1], strides = [1, 1, 1]} : vector<4x4x9xf32> to vector<1x4x1xf32>
    %460 = vector.shape_cast %459 : vector<1x4x1xf32> to vector<4x1xf32>
    %461 = vector.broadcast %460 : vector<4x1xf32> to vector<4x256xf32>
    %462 = arith.mulf %461, %229 : vector<4x256xf32>
    %463 = arith.addf %458, %462 : vector<4x256xf32>
    %464 = vector.extract_strided_slice %4 {offsets = [2, 0, 2], sizes = [1, 4, 1], strides = [1, 1, 1]} : vector<4x4x9xf32> to vector<1x4x1xf32>
    %465 = vector.shape_cast %464 : vector<1x4x1xf32> to vector<4x1xf32>
    %466 = vector.broadcast %465 : vector<4x1xf32> to vector<4x256xf32>
    %467 = arith.mulf %466, %247 : vector<4x256xf32>
    %468 = arith.addf %463, %467 : vector<4x256xf32>
    %469 = vector.extract_strided_slice %4 {offsets = [2, 0, 3], sizes = [1, 4, 1], strides = [1, 1, 1]} : vector<4x4x9xf32> to vector<1x4x1xf32>
    %470 = vector.shape_cast %469 : vector<1x4x1xf32> to vector<4x1xf32>
    %471 = vector.broadcast %470 : vector<4x1xf32> to vector<4x256xf32>
    %472 = arith.mulf %471, %265 : vector<4x256xf32>
    %473 = arith.addf %468, %472 : vector<4x256xf32>
    %474 = vector.extract_strided_slice %4 {offsets = [2, 0, 4], sizes = [1, 4, 1], strides = [1, 1, 1]} : vector<4x4x9xf32> to vector<1x4x1xf32>
    %475 = vector.shape_cast %474 : vector<1x4x1xf32> to vector<4x1xf32>
    %476 = vector.broadcast %475 : vector<4x1xf32> to vector<4x256xf32>
    %477 = arith.mulf %476, %193 : vector<4x256xf32>
    %478 = arith.addf %473, %477 : vector<4x256xf32>
    %479 = vector.extract_strided_slice %4 {offsets = [2, 0, 5], sizes = [1, 4, 1], strides = [1, 1, 1]} : vector<4x4x9xf32> to vector<1x4x1xf32>
    %480 = vector.shape_cast %479 : vector<1x4x1xf32> to vector<4x1xf32>
    %481 = vector.broadcast %480 : vector<4x1xf32> to vector<4x256xf32>
    %482 = arith.mulf %481, %283 : vector<4x256xf32>
    %483 = arith.addf %478, %482 : vector<4x256xf32>
    %484 = vector.extract_strided_slice %4 {offsets = [2, 0, 6], sizes = [1, 4, 1], strides = [1, 1, 1]} : vector<4x4x9xf32> to vector<1x4x1xf32>
    %485 = vector.shape_cast %484 : vector<1x4x1xf32> to vector<4x1xf32>
    %486 = vector.broadcast %485 : vector<4x1xf32> to vector<4x256xf32>
    %487 = arith.mulf %486, %301 : vector<4x256xf32>
    %488 = arith.addf %483, %487 : vector<4x256xf32>
    %489 = vector.extract_strided_slice %4 {offsets = [2, 0, 7], sizes = [1, 4, 1], strides = [1, 1, 1]} : vector<4x4x9xf32> to vector<1x4x1xf32>
    %490 = vector.shape_cast %489 : vector<1x4x1xf32> to vector<4x1xf32>
    %491 = vector.broadcast %490 : vector<4x1xf32> to vector<4x256xf32>
    %492 = arith.mulf %491, %319 : vector<4x256xf32>
    %493 = arith.addf %488, %492 : vector<4x256xf32>
    %494 = vector.extract_strided_slice %4 {offsets = [2, 0, 8], sizes = [1, 4, 1], strides = [1, 1, 1]} : vector<4x4x9xf32> to vector<1x4x1xf32>
    %495 = vector.shape_cast %494 : vector<1x4x1xf32> to vector<4x1xf32>
    %496 = vector.broadcast %495 : vector<4x1xf32> to vector<4x256xf32>
    %497 = arith.mulf %496, %337 : vector<4x256xf32>
    %498 = arith.addf %493, %497 : vector<4x256xf32>
    %499 = vector.broadcast %350 : vector<1x256xf32> to vector<4x256xf32>
    %500 = arith.mulf %499, %498 : vector<4x256xf32>
    %501 = arith.addf %452, %500 : vector<4x256xf32>
    %cst_122 = arith.constant 0.000000e+00 : f32
    %502 = vector.broadcast %cst_122 : f32 to vector<4x256xf32>
    %503 = vector.extract_strided_slice %4 {offsets = [3, 0, 0], sizes = [1, 4, 1], strides = [1, 1, 1]} : vector<4x4x9xf32> to vector<1x4x1xf32>
    %504 = vector.shape_cast %503 : vector<1x4x1xf32> to vector<4x1xf32>
    %505 = vector.broadcast %504 : vector<4x1xf32> to vector<4x256xf32>
    %506 = arith.mulf %505, %211 : vector<4x256xf32>
    %507 = arith.addf %502, %506 : vector<4x256xf32>
    %508 = vector.extract_strided_slice %4 {offsets = [3, 0, 1], sizes = [1, 4, 1], strides = [1, 1, 1]} : vector<4x4x9xf32> to vector<1x4x1xf32>
    %509 = vector.shape_cast %508 : vector<1x4x1xf32> to vector<4x1xf32>
    %510 = vector.broadcast %509 : vector<4x1xf32> to vector<4x256xf32>
    %511 = arith.mulf %510, %229 : vector<4x256xf32>
    %512 = arith.addf %507, %511 : vector<4x256xf32>
    %513 = vector.extract_strided_slice %4 {offsets = [3, 0, 2], sizes = [1, 4, 1], strides = [1, 1, 1]} : vector<4x4x9xf32> to vector<1x4x1xf32>
    %514 = vector.shape_cast %513 : vector<1x4x1xf32> to vector<4x1xf32>
    %515 = vector.broadcast %514 : vector<4x1xf32> to vector<4x256xf32>
    %516 = arith.mulf %515, %247 : vector<4x256xf32>
    %517 = arith.addf %512, %516 : vector<4x256xf32>
    %518 = vector.extract_strided_slice %4 {offsets = [3, 0, 3], sizes = [1, 4, 1], strides = [1, 1, 1]} : vector<4x4x9xf32> to vector<1x4x1xf32>
    %519 = vector.shape_cast %518 : vector<1x4x1xf32> to vector<4x1xf32>
    %520 = vector.broadcast %519 : vector<4x1xf32> to vector<4x256xf32>
    %521 = arith.mulf %520, %265 : vector<4x256xf32>
    %522 = arith.addf %517, %521 : vector<4x256xf32>
    %523 = vector.extract_strided_slice %4 {offsets = [3, 0, 4], sizes = [1, 4, 1], strides = [1, 1, 1]} : vector<4x4x9xf32> to vector<1x4x1xf32>
    %524 = vector.shape_cast %523 : vector<1x4x1xf32> to vector<4x1xf32>
    %525 = vector.broadcast %524 : vector<4x1xf32> to vector<4x256xf32>
    %526 = arith.mulf %525, %193 : vector<4x256xf32>
    %527 = arith.addf %522, %526 : vector<4x256xf32>
    %528 = vector.extract_strided_slice %4 {offsets = [3, 0, 5], sizes = [1, 4, 1], strides = [1, 1, 1]} : vector<4x4x9xf32> to vector<1x4x1xf32>
    %529 = vector.shape_cast %528 : vector<1x4x1xf32> to vector<4x1xf32>
    %530 = vector.broadcast %529 : vector<4x1xf32> to vector<4x256xf32>
    %531 = arith.mulf %530, %283 : vector<4x256xf32>
    %532 = arith.addf %527, %531 : vector<4x256xf32>
    %533 = vector.extract_strided_slice %4 {offsets = [3, 0, 6], sizes = [1, 4, 1], strides = [1, 1, 1]} : vector<4x4x9xf32> to vector<1x4x1xf32>
    %534 = vector.shape_cast %533 : vector<1x4x1xf32> to vector<4x1xf32>
    %535 = vector.broadcast %534 : vector<4x1xf32> to vector<4x256xf32>
    %536 = arith.mulf %535, %301 : vector<4x256xf32>
    %537 = arith.addf %532, %536 : vector<4x256xf32>
    %538 = vector.extract_strided_slice %4 {offsets = [3, 0, 7], sizes = [1, 4, 1], strides = [1, 1, 1]} : vector<4x4x9xf32> to vector<1x4x1xf32>
    %539 = vector.shape_cast %538 : vector<1x4x1xf32> to vector<4x1xf32>
    %540 = vector.broadcast %539 : vector<4x1xf32> to vector<4x256xf32>
    %541 = arith.mulf %540, %319 : vector<4x256xf32>
    %542 = arith.addf %537, %541 : vector<4x256xf32>
    %543 = vector.extract_strided_slice %4 {offsets = [3, 0, 8], sizes = [1, 4, 1], strides = [1, 1, 1]} : vector<4x4x9xf32> to vector<1x4x1xf32>
    %544 = vector.shape_cast %543 : vector<1x4x1xf32> to vector<4x1xf32>
    %545 = vector.broadcast %544 : vector<4x1xf32> to vector<4x256xf32>
    %546 = arith.mulf %545, %337 : vector<4x256xf32>
    %547 = arith.addf %542, %546 : vector<4x256xf32>
    %548 = vector.broadcast %353 : vector<1x256xf32> to vector<4x256xf32>
    %549 = arith.mulf %548, %547 : vector<4x256xf32>
    %550 = arith.addf %501, %549 : vector<4x256xf32>
    %551 = vector.extract_strided_slice %550 {offsets = [0, 1], sizes = [4, 255], strides = [1, 1]} : vector<4x256xf32> to vector<4x255xf32>
    %cst_123 = arith.constant 0.000000e+00 : f32
    %552 = vector.broadcast %cst_123 : f32 to vector<4x1xf32>
    %553 = tpu.concatenate %551, %552 in 1 : vector<4x255xf32>, vector<4x1xf32> -> vector<4x256xf32>
    %cst_124 = arith.constant 0.000000e+00 : f32
    %554 = vector.broadcast %cst_124 : f32 to vector<4x1xf32>
    %555 = vector.extract_strided_slice %550 {offsets = [0, 0], sizes = [4, 255], strides = [1, 1]} : vector<4x256xf32> to vector<4x255xf32>
    %556 = tpu.concatenate %554, %555 in 1 : vector<4x1xf32>, vector<4x255xf32> -> vector<4x256xf32>
    %557 = vector.extract_strided_slice %550 {offsets = [0, 16], sizes = [4, 240], strides = [1, 1]} : vector<4x256xf32> to vector<4x240xf32>
    %cst_125 = arith.constant 0.000000e+00 : f32
    %558 = vector.broadcast %cst_125 : f32 to vector<4x16xf32>
    %559 = tpu.concatenate %557, %558 in 1 : vector<4x240xf32>, vector<4x16xf32> -> vector<4x256xf32>
    %cst_126 = arith.constant 0.000000e+00 : f32
    %560 = vector.broadcast %cst_126 : f32 to vector<4x16xf32>
    %561 = vector.extract_strided_slice %550 {offsets = [0, 0], sizes = [4, 240], strides = [1, 1]} : vector<4x256xf32> to vector<4x240xf32>
    %562 = tpu.concatenate %560, %561 in 1 : vector<4x16xf32>, vector<4x240xf32> -> vector<4x256xf32>
    %563 = vector.shape_cast %15 : vector<1x256xi1> to vector<1x256xi1>
    %564 = vector.broadcast %563 : vector<1x256xi1> to vector<4x256xi1>
    %565 = arith.select %564, %556, %553 : vector<4x256xi1>, vector<4x256xf32>
    %566 = vector.shape_cast %11 : vector<1x256xi1> to vector<1x256xi1>
    %567 = vector.broadcast %566 : vector<1x256xi1> to vector<4x256xi1>
    %568 = arith.select %567, %562, %559 : vector<4x256xi1>, vector<4x256xf32>
    %cst_127 = arith.constant 0.000000e+00 : f32
    %569 = vector.broadcast %cst_127 : f32 to vector<4x1xf32>
    %570 = vector.extract_strided_slice %568 {offsets = [0, 0], sizes = [4, 255], strides = [1, 1]} : vector<4x256xf32> to vector<4x255xf32>
    %571 = tpu.concatenate %569, %570 in 1 : vector<4x1xf32>, vector<4x255xf32> -> vector<4x256xf32>
    %572 = vector.extract_strided_slice %568 {offsets = [0, 1], sizes = [4, 255], strides = [1, 1]} : vector<4x256xf32> to vector<4x255xf32>
    %cst_128 = arith.constant 0.000000e+00 : f32
    %573 = vector.broadcast %cst_128 : f32 to vector<4x1xf32>
    %574 = tpu.concatenate %572, %573 in 1 : vector<4x255xf32>, vector<4x1xf32> -> vector<4x256xf32>
    %575 = vector.shape_cast %15 : vector<1x256xi1> to vector<1x256xi1>
    %576 = vector.broadcast %575 : vector<1x256xi1> to vector<4x256xi1>
    %577 = arith.select %576, %571, %574 : vector<4x256xi1>, vector<4x256xf32>
    %578 = vector.broadcast %19 : vector<1x256xf32> to vector<4x256xf32>
    %579 = arith.mulf %578, %565 : vector<4x256xf32>
    %580 = arith.addf %550, %579 : vector<4x256xf32>
    %581 = vector.broadcast %22 : vector<1x256xf32> to vector<4x256xf32>
    %582 = arith.mulf %581, %568 : vector<4x256xf32>
    %583 = arith.addf %580, %582 : vector<4x256xf32>
    %584 = vector.broadcast %23 : vector<1x256xf32> to vector<4x256xf32>
    %585 = arith.mulf %584, %577 : vector<4x256xf32>
    %586 = arith.addf %583, %585 : vector<4x256xf32>
    %cst_129 = arith.constant 5.000000e-01 : f32
    %587 = vector.broadcast %cst_129 : f32 to vector<4x256xf32>
    %588 = arith.mulf %587, %586 : vector<4x256xf32>
    %cst_130 = arith.constant 0.000000e+00 : f32
    %589 = vector.broadcast %cst_130 : f32 to vector<4x256xf32>
    %590 = vector.extract_strided_slice %2 {offsets = [0, 0], sizes = [4, 1], strides = [1, 1]} : vector<4x9xf32> to vector<4x1xf32>
    %591 = vector.broadcast %590 : vector<4x1xf32> to vector<4x256xf32>
    %592 = arith.mulf %591, %41 : vector<4x256xf32>
    %593 = arith.addf %589, %592 : vector<4x256xf32>
    %594 = vector.extract_strided_slice %2 {offsets = [0, 1], sizes = [4, 1], strides = [1, 1]} : vector<4x9xf32> to vector<4x1xf32>
    %595 = vector.broadcast %594 : vector<4x1xf32> to vector<4x256xf32>
    %596 = arith.mulf %595, %59 : vector<4x256xf32>
    %597 = arith.addf %593, %596 : vector<4x256xf32>
    %598 = vector.extract_strided_slice %2 {offsets = [0, 2], sizes = [4, 1], strides = [1, 1]} : vector<4x9xf32> to vector<4x1xf32>
    %599 = vector.broadcast %598 : vector<4x1xf32> to vector<4x256xf32>
    %600 = arith.mulf %599, %77 : vector<4x256xf32>
    %601 = arith.addf %597, %600 : vector<4x256xf32>
    %602 = vector.extract_strided_slice %2 {offsets = [0, 3], sizes = [4, 1], strides = [1, 1]} : vector<4x9xf32> to vector<4x1xf32>
    %603 = vector.broadcast %602 : vector<4x1xf32> to vector<4x256xf32>
    %604 = arith.mulf %603, %95 : vector<4x256xf32>
    %605 = arith.addf %601, %604 : vector<4x256xf32>
    %606 = vector.extract_strided_slice %2 {offsets = [0, 4], sizes = [4, 1], strides = [1, 1]} : vector<4x9xf32> to vector<4x1xf32>
    %607 = vector.broadcast %606 : vector<4x1xf32> to vector<4x256xf32>
    %608 = arith.mulf %607, %1 : vector<4x256xf32>
    %609 = arith.addf %605, %608 : vector<4x256xf32>
    %610 = vector.extract_strided_slice %2 {offsets = [0, 5], sizes = [4, 1], strides = [1, 1]} : vector<4x9xf32> to vector<4x1xf32>
    %611 = vector.broadcast %610 : vector<4x1xf32> to vector<4x256xf32>
    %612 = arith.mulf %611, %113 : vector<4x256xf32>
    %613 = arith.addf %609, %612 : vector<4x256xf32>
    %614 = vector.extract_strided_slice %2 {offsets = [0, 6], sizes = [4, 1], strides = [1, 1]} : vector<4x9xf32> to vector<4x1xf32>
    %615 = vector.broadcast %614 : vector<4x1xf32> to vector<4x256xf32>
    %616 = arith.mulf %615, %131 : vector<4x256xf32>
    %617 = arith.addf %613, %616 : vector<4x256xf32>
    %618 = vector.extract_strided_slice %2 {offsets = [0, 7], sizes = [4, 1], strides = [1, 1]} : vector<4x9xf32> to vector<4x1xf32>
    %619 = vector.broadcast %618 : vector<4x1xf32> to vector<4x256xf32>
    %620 = arith.mulf %619, %149 : vector<4x256xf32>
    %621 = arith.addf %617, %620 : vector<4x256xf32>
    %622 = vector.extract_strided_slice %2 {offsets = [0, 8], sizes = [4, 1], strides = [1, 1]} : vector<4x9xf32> to vector<4x1xf32>
    %623 = vector.broadcast %622 : vector<4x1xf32> to vector<4x256xf32>
    %624 = arith.mulf %623, %167 : vector<4x256xf32>
    %625 = arith.addf %621, %624 : vector<4x256xf32>
    %626 = vector.broadcast %3 : vector<4x1xf32> to vector<4x256xf32>
    %627 = arith.addf %625, %626 : vector<4x256xf32>
    %628 = arith.addf %627, %588 : vector<4x256xf32>
    %c0_i32_131 = arith.constant 0 : i32
    %629 = arith.cmpi eq, %arg1, %c0_i32_131 : i32
    %630 = arith.extui %629 : i1 to i32
    %c0_i32_132 = arith.constant 0 : i32
    %631 = arith.cmpi ne, %630, %c0_i32_132 : i32
    scf.if %631 {
      %cst_140 = arith.constant 0.000000e+00 : f32
      %663 = vector.broadcast %cst_140 : f32 to vector<1x8x256xf32>
      %c0_141 = arith.constant 0 : index
      %c0_142 = arith.constant 0 : index
      %c0_143 = arith.constant 0 : index
      %664 = vector.load %arg9[%c0_141, %c0_142, %c0_143] : memref<1x8x256xf32, #tpu.memory_space<vmem>>, vector<1x8x256xf32>
      tpu.vector_store %arg9[%c0_141, %c0_142, %c0_143], %663 {strides = array<i32>} : memref<1x8x256xf32, #tpu.memory_space<vmem>>, vector<1x8x256xf32>,
    } else {
    }
    %cst_133 = arith.constant 0.000000e+00 : f32
    %632 = vector.broadcast %cst_133 : f32 to vector<8x256xf32>
    %633 = vector.extract_strided_slice %5 {offsets = [0, 0], sizes = [8, 1], strides = [1, 1]} : vector<8x4xf32> to vector<8x1xf32>
    %634 = vector.extract_strided_slice %628 {offsets = [0, 0], sizes = [1, 256], strides = [1, 1]} : vector<4x256xf32> to vector<1x256xf32>
    %635 = vector.broadcast %633 : vector<8x1xf32> to vector<8x256xf32>
    %636 = vector.broadcast %634 : vector<1x256xf32> to vector<8x256xf32>
    %637 = arith.mulf %635, %636 : vector<8x256xf32>
    %638 = arith.addf %632, %637 : vector<8x256xf32>
    %639 = vector.extract_strided_slice %5 {offsets = [0, 1], sizes = [8, 1], strides = [1, 1]} : vector<8x4xf32> to vector<8x1xf32>
    %640 = vector.extract_strided_slice %628 {offsets = [1, 0], sizes = [1, 256], strides = [1, 1]} : vector<4x256xf32> to vector<1x256xf32>
    %641 = vector.broadcast %639 : vector<8x1xf32> to vector<8x256xf32>
    %642 = vector.broadcast %640 : vector<1x256xf32> to vector<8x256xf32>
    %643 = arith.mulf %641, %642 : vector<8x256xf32>
    %644 = arith.addf %638, %643 : vector<8x256xf32>
    %645 = vector.extract_strided_slice %5 {offsets = [0, 2], sizes = [8, 1], strides = [1, 1]} : vector<8x4xf32> to vector<8x1xf32>
    %646 = vector.extract_strided_slice %628 {offsets = [2, 0], sizes = [1, 256], strides = [1, 1]} : vector<4x256xf32> to vector<1x256xf32>
    %647 = vector.broadcast %645 : vector<8x1xf32> to vector<8x256xf32>
    %648 = vector.broadcast %646 : vector<1x256xf32> to vector<8x256xf32>
    %649 = arith.mulf %647, %648 : vector<8x256xf32>
    %650 = arith.addf %644, %649 : vector<8x256xf32>
    %651 = vector.extract_strided_slice %5 {offsets = [0, 3], sizes = [8, 1], strides = [1, 1]} : vector<8x4xf32> to vector<8x1xf32>
    %652 = vector.extract_strided_slice %628 {offsets = [3, 0], sizes = [1, 256], strides = [1, 1]} : vector<4x256xf32> to vector<1x256xf32>
    %653 = vector.broadcast %651 : vector<8x1xf32> to vector<8x256xf32>
    %654 = vector.broadcast %652 : vector<1x256xf32> to vector<8x256xf32>
    %655 = arith.mulf %653, %654 : vector<8x256xf32>
    %656 = arith.addf %650, %655 : vector<8x256xf32>
    %c0_134 = arith.constant 0 : index
    %c0_135 = arith.constant 0 : index
    %c0_136 = arith.constant 0 : index
    %657 = vector.load %arg9[%c0_134, %c0_135, %c0_136] : memref<1x8x256xf32, #tpu.memory_space<vmem>>, vector<1x8x256xf32>
    %658 = vector.shape_cast %657 : vector<1x8x256xf32> to vector<8x256xf32>
    %659 = arith.addf %658, %656 : vector<8x256xf32>
    %c0_137 = arith.constant 0 : index
    %c0_138 = arith.constant 0 : index
    %c0_139 = arith.constant 0 : index
    %660 = vector.load %arg9[%c0_137, %c0_138, %c0_139] : memref<1x8x256xf32, #tpu.memory_space<vmem>>, vector<1x8x256xf32>
    %661 = vector.shape_cast %660 : vector<1x8x256xf32> to vector<8x256xf32>
    %662 = vector.shape_cast %659 : vector<8x256xf32> to vector<1x8x256xf32>
    tpu.vector_store %arg9[%c0_137, %c0_138, %c0_139], %662 {strides = array<i32>} : memref<1x8x256xf32, #tpu.memory_space<vmem>>, vector<1x8x256xf32>,
    return
  }
  func.func @transform_0(%arg0: i32, %arg1: i32) -> (i32, i32, i32) {
    %c0_i32 = arith.constant 0 : i32
    %c0_i32_0 = arith.constant 0 : i32
    return %arg0, %arg1, %c0_i32 : i32, i32, i32
  }
  func.func @transform_1(%arg0: i32, %arg1: i32) -> (i32, i32) {
    %c0_i32 = arith.constant 0 : i32
    %c0_i32_0 = arith.constant 0 : i32
    return %arg1, %c0_i32 : i32, i32
  }
  func.func @transform_2(%arg0: i32, %arg1: i32) -> (i32, i32) {
    %c0_i32 = arith.constant 0 : i32
    %c0_i32_0 = arith.constant 0 : i32
    return %arg1, %c0_i32 : i32, i32
  }
  func.func @transform_3(%arg0: i32, %arg1: i32) -> (i32, i32, i32) {
    %c0_i32 = arith.constant 0 : i32
    %c0_i32_0 = arith.constant 0 : i32
    %c0_i32_1 = arith.constant 0 : i32
    return %c0_i32, %arg1, %c0_i32_0 : i32, i32, i32
  }
  func.func @transform_4(%arg0: i32, %arg1: i32) -> (i32, i32) {
    %c0_i32 = arith.constant 0 : i32
    %c0_i32_0 = arith.constant 0 : i32
    return %c0_i32, %arg1 : i32, i32
  }
  func.func @transform_5(%arg0: i32, %arg1: i32) -> (i32, i32) {
    %c0_i32 = arith.constant 0 : i32
    %c0_i32_0 = arith.constant 0 : i32
    %c0_i32_1 = arith.constant 0 : i32
    return %c0_i32, %c0_i32_0 : i32, i32
  }
  func.func @transform_6(%arg0: i32, %arg1: i32) -> (i32, i32) {
    %c0_i32 = arith.constant 0 : i32
    %c0_i32_0 = arith.constant 0 : i32
    %c0_i32_1 = arith.constant 0 : i32
    return %c0_i32, %c0_i32_0 : i32, i32
  }
  func.func @transform_7(%arg0: i32, %arg1: i32) -> (i32, i32, i32) {
    %c0_i32 = arith.constant 0 : i32
    %c0_i32_0 = arith.constant 0 : i32
    %c0_i32_1 = arith.constant 0 : i32
    return %arg0, %c0_i32, %c0_i32_0 : i32, i32, i32
  }
}

</mosaic_0001>

<bundles_post_ra>
// kernel: dsconv_wt_forward.1
= control target key start
LH: loop header
LB: loop body
LE: loop exit
PB: predicated region body
PF: predicated region fallthrough
CT: control target
= control target key end

     0   :  { %s1834_s24 = smov 0   ;;  %s1836_s25 = smov 0   ;;  %s3040_s0 = inlined_call_operand.vmem [shape: f32[2,4,256], index: 0, kind: input, shape index: {}]   ;;  %s3041_s1 = inlined_call_operand.vmem [shape: f32[4,9], index: 1, kind: input, shape index: {}]   ;;  %s3042_s2 = inlined_call_operand.vmem [shape: f32[4,1], index: 2, kind: input, shape index: {}]   ;;  %s3043_s3 = inlined_call_operand.vmem [shape: f32[4,4,9], index: 3, kind: input, shape index: {}]   ;;  %s3044_s4 = inlined_call_operand.vmem [shape: f32[8,4], index: 4, kind: input, shape index: {}]   ;;  %s3045_s5 = inlined_call_operand.vmem [shape: s32[1,256], index: 5, kind: input, shape index: {}]   ;;  %s3046_s6 = inlined_call_operand.vmem [shape: s32[1,256], index: 6, kind: input, shape index: {}]   ;;  %s3047_s7 = inlined_call_operand.vmem [shape: f32[2,8,256], index: 7, kind: output, shape index: {}]  }
   0x1   :  { %s1838_s26 = smov 0  }
   0x2 LB: > { %s29_s27 = sadd.s32 1, %s1760_s25  ;;  %p1640_p0 = scmp.ge.s32.totalorder %s1764_s26, 1  ;;  %s1764_s26 = sphi %s1838_s26, %s17_s26   ;;  %s1760_s25 = sphi %s1836_s25, %s3420_s25   ;;  %s1756_s24 = sphi %s1834_s24, %s3419_s24  }
   0x3   : > { %p31_p1 = scmp.ge.s32.totalorder %s29_s27, 2  ;;  %p291_p2 = scmp.lt.s32.totalorder %s1764_s26, 3 }
   0x5   : > { %s3422_s27 = smov (%p31_p1, %s29_s27), 0  ;;  %p292_p3 = pnand %p1640_p0, %p291_p2 }
   0x7   : > { %295 = sbr.rel (%p292_p3) target bundleno = 715 (0x2cb), region = 48 }
   0xe   : > { %p343_p4 = scmp.lt.s32.totalorder %s1756_s24, 1  ;;  %v3069_v0 = vmov 0   ;;  %v3059_v1 = vmov 1   ;;  %s1768_s9 = smov 112   ;;  %v1896_v4 = vld [vmem:[%s3045_s5] sm:$0x3]  ;;  %v409_v20 = vlaneseq }
   0xf   : > { %1701 = vset.pattern.permute.xlu1 %v3069_v0  ;;  %1702 = vset.pattern.permute.xlu0 %v3059_v1  ;;  %s1769_s10 = smov 16   ;;  %s1770_s11 = smov 1   ;;  %v1901_v5 = vld [vmem:[%s3043_s3] sm:$0xf]  ;;  %vm401_vm0 = vcmp.ge.s32.totalorder %v1896_v4, 1  ;;  %vm402_vm1 = vcmp.lt.s32.totalorder %v1896_v4, 17 }
  0x10   : > { %s3424_s24 = smov (!%p343_p4, %s1756_s24), 1  ;;  %s1771_s12 = smov 127   ;;  %v1910_v6 = vld [vmem:[%s3043_s3 + $0x4] sm:$0xf]  ;;  %v1915_v7 = vld [vmem:[%s3046_s6] sm:$0x3]  ;;  %vm1917_vm2 = vmand %vm401_vm0, %vm402_vm1 }
  0x11   : > { %s1647_s28 = sshll.u32 %s3424_s24, 3  ;;  %s1772_s13 = smov 17   ;;  %vm404_vm3 = vcmp.ge.s32.totalorder %v1915_v7, 1  ;;  %v1925_v9 = vld [vmem:[%s3043_s3 + $0x8] sm:$0xf]  ;;  %vm3051_vm4 = vcmp.lt.s32.totalorder %v1915_v7, 17 }
  0x12   : > { %s1860_s8 = scalar_lea.vmem %s3040_s0, %s1647_s28  ;;  %s1773_s14 = smov 15   ;;  %vm405_vm5 = vmand %vm1917_vm2, %vm404_vm3  ;;  %vm456_vm7 = vcmp.ge.s32.totalorder %v1915_v7, 4294967295  ;;  %vm533_vm8 = vcmp.ge.s32.totalorder %v1896_v4, 4294967295  ;;  %vm534_vm9 = vcmp.lt.s32.totalorder %v1896_v4, 15  ;;  %vm3050_vm10 = vcmp.lt.s32.totalorder %v1915_v7, 15 }
  0x13   : > { %v1863_v2 = vld [vmem:[%s1860_s8] sm:$0xff]  ;;  %s1774_s15 = smov 113   ;;  %s1775_s16 = smov 111   ;;  %vm1936_vm6 = vmand %vm405_vm5, %vm3051_vm4  ;;  %v3065_v11 = vmov 2   ;;  %v3067_v16 = vmov 3   ;;  %v3063_v18 = vmov 4  }
  0x14   : > { %551 = vrot.lane.b32.xlu1 %v1863_v2, %s1768_s9  ;;  %421 = vrot.lane.b32.xlu0 %v1863_v2, %s1769_s10  ;;  %v1871_v3 = vcombine.high %v1863_v2, %v1863_v2  ;;  %vm457_vm11 = vmand %vm1917_vm2, %vm456_vm7  ;;  %v1993_v17 = vld [vmem:[%s3043_s3 + $0xc] sm:$0xf]  ;;  %v3062_v19 = vmov 5   ;;  %vm3049_vm5 = vcmp.ge.s32.totalorder %v1915_v7, 0  ;;  %v2010_v21 = vshrl.u32 %v409_v20, 7  ;;  %s1786_s17 = smov 32  }
  0x15   : > { %vm1952_vm12 = vmand %vm457_vm11, %vm3050_vm10  ;;  %v383_v22 = vand.u32 1, %v1896_v4  ;;  %v385_v25 = vand.u32 1, %v1915_v7  ;;  %v3071_v39 = vmov 1.0   ;;  %v3166_v44 = vmov 0  ;;  %s1787_s18 = smov 30   ;;  %s1788_s19 = smov 2  }
  0x16   : > { %3148 = vst [vmem:[#allocation2_spill] sm:$0xff] %v1871_v3  ;;  %vm1958_vm13 = vmand %vm533_vm8, %vm534_vm9  ;;  %vm3048_vm9 = vcmp.lt.s32.totalorder %v1915_v7, 16  ;;  %v2022_v23 = vsub.s32 0, %v2010_v21  ;;  %v2031_v27 = vsub.s32 1, %v2010_v21  ;;  %v3170_v46 = vmov 0  ;;  %s1789_s20 = smov 126  }
  0x17   : > { %vm536_vm14 = vmand %vm1958_vm13, %vm404_vm3  ;;  %3161 = vst [vmem:[#allocation3_spill] sm:$0xff] %v2010_v21  ;;  %v408_v61 = vsel %vm1936_vm6, 1, %v3069_v0  ;;  %v460_v10 = vsel %vm1952_vm12, 1, %v3069_v0  ;;  %vm396_vm6 = vcmask 138240   ;;  %vm451_vm12 = vcmask 121856   ;;  %s1790_s21 = smov 98  }
  0x18   : > { %553 = vrot.lane.b32.xlu1 %v1871_v3, %s1768_s9  ;;  %423 = vrot.lane.b32.xlu0 %v1871_v3, %s1769_s10  ;;  %vm1968_vm15 = vmand %vm536_vm14, %vm3051_vm4  ;;  %v412_v63 = vrot.slane %v408_v61, %v2022_v23  ;;  %v416_v8 = vrot.slane %v408_v61, %v2031_v27  ;;  %v3190_v14 = vmov 0  ;;  %s1791_s22 = smov 96  }
  0x19   : > { %vm584_vm0 = vmand %vm1958_vm13, %vm456_vm7 }
  0x1a   : > { %vm1981_vm1 = vmand %vm584_vm0, %vm3050_vm10 }
  0x1b   : > { %vm431_vm8 = vmand %vm1917_vm2, %vm3049_vm5  ;;  %vm2024_vm2 = vcmp.eq.s32.totalorder %v383_v22, 1  ;;  %v464_v22 = vrot.slane %v460_v10, %v2022_v23 }
  0x1c   : > { %475 = vrot.lane.b32.xlu1 %v1871_v3, %s1770_s11  ;;  %473 = vrot.lane.b32.xlu0 %v1863_v2, %s1770_s11  ;;  %vm560_vm11 = vmand %vm1958_vm13, %vm3049_vm5  ;;  %v612_v29 = vsel %vm2024_vm2, 1, %v3069_v0  ;;  %vm2038_vm13 = vcmp.eq.s32.totalorder %v385_v25, 1  ;;  %v468_v25 = vrot.slane %v460_v10, %v2031_v27  ;;  %v3201_v10 = vmov 0 }
  0x1d   : > { %vm433_vm14 = vmand %vm431_vm8, %vm3048_vm9  ;;  %vm3054_vm8 = vcmask 130048   ;;  %v616_v37 = vrot.slane %v612_v29, %v2022_v23  ;;  %v620_v38 = vrot.slane %v612_v29, %v2031_v27  ;;  %v2050_v40 = vsel %vm2038_vm13, -1.0, %v3071_v39 }
  0x1e   : > { %vm561_vm0 = vmand %vm560_vm11, %vm3048_vm9  ;;  %v434_v26 = vsel %vm433_vm14, 1, %v3069_v0  ;;  %vm3055_vm14 = vcmask 916480   ;;  %v2059_v45 = vrot.slane %v2050_v40, %v2022_v23  ;;  %v2067_v47 = vrot.slane %v2050_v40, %v2031_v27 }
  0x1f   : > { %v562_v28 = vsel %vm561_vm0, 1, %v3069_v0  ;;  %v438_v30 = vrot.slane %v434_v26, %v2022_v23  ;;  %v442_v32 = vrot.slane %v434_v26, %v2031_v27  ;;  %vm2053_vm10 = vcmp.eq.s32.totalorder %v616_v37, 1 }
  0x20   : > { %502 = vrot.lane.b32.xlu1 %v1871_v3, %s1771_s12  ;;  %500 = vrot.lane.b32.xlu0 %v1863_v2, %s1771_s12  ;;  %v566_v33 = vrot.slane %v562_v28, %v2022_v23  ;;  %v570_v34 = vrot.slane %v562_v28, %v2031_v27  ;;  %v3167_v44 = vsel %vm2053_vm10, 4294967295, %v3166_v44  ;;  %3169 = vst [vmem:[#allocation5_spill] sm:$0xff] %v2059_v45  ;;  %vm2061_vm4 = vcmp.eq.s32.totalorder %v620_v38, 1 }
  0x21   : > { %vm443_vm11 = vcmp.eq.s32.totalorder %v438_v30, 1  ;;  %vm444_vm0 = vcmp.eq.s32.totalorder %v442_v32, 1  ;;  %3168 = vst [vmem:[#allocation4_spill] sm:$0xff] %v3167_v44  ;;  %v3171_v46 = vsel %vm2061_vm4, 4294967295, %v3170_v46  ;;  %3173 = vst [vmem:[#allocation7_spill] sm:$0xff] %v2067_v47  ;;  %v3178_v26 = vmov 0 }
  0x22   : > { %vm571_vm9 = vcmp.eq.s32.totalorder %v566_v33, 1  ;;  %vm572_vm5 = vcmp.eq.s32.totalorder %v570_v34, 1  ;;  %3172 = vst [vmem:[#allocation6_spill] sm:$0xff] %v3171_v46  ;;  %v3181_v28 = vmov 0  ;;  %v2131_v30 = vsel %vm1968_vm15, 1, %v3069_v0 }
  0x23   : > { %3184 = vst [vmem:[#allocation14_spill] sm:$0xff] %v2131_v30  ;;  %v542_v37 = vrot.slane %v2131_v30, %v2022_v23  ;;  %vm3053_vm15 = vcmask 924672   ;;  %v1793_v44 = vmov 0.0  }
  0x24   : > { %394 = vrot.lane.b32.xlu1 %v1871_v3, %s1772_s13  ;;  %392 = vrot.lane.b32.xlu0 %v1863_v2, %s1772_s13 }
  0x28   : > { %449 = vrot.lane.b32.xlu1 %v1871_v3, %s1773_s14  ;;  %447 = vrot.lane.b32.xlu0 %v1863_v2, %s1773_s14 }
  0x2c   : > { %526 = vrot.lane.b32.xlu1 %v1871_v3, %s1774_s15  ;;  %524 = vrot.lane.b32.xlu0 %v1863_v2, %s1774_s15  ;;  %s1784_s15 = smov 94  }
  0x30   : > { %577 = vrot.lane.b32.xlu1 %v1871_v3, %s1775_s16  ;;  %575 = vrot.lane.b32.xlu0 %v1863_v2, %s1775_s16  ;;  %s1785_s16 = smov 34  }
  0x34   : > { %916 = vperm.xlu1 %1701, %v1901_v5   ;;  %924 = vperm.xlu0 %1702, %v1901_v5  }
  0x38   : > { %1005 = vperm.xlu1 %1701, %v1910_v6   ;;  %1101 = vperm.xlu0 %1702, %v1925_v9  }
  0x3c   : > { %1703 = vset.pattern.permute.xlu1 %v3059_v1  ;;  %1706 = vset.pattern.permute.xlu0 %v3065_v11 }
  0x3d   : > { %1013 = vperm.xlu1 %1703, %v1910_v6   ;;  %932 = vperm.xlu0 %1706, %v1901_v5  }
  0x41   : > { %1704 = vset.pattern.permute.xlu1 %v3065_v11  ;;  %1109 = vperm.xlu0 %1706, %v1925_v9  }
  0x42   : > { %1021 = vperm.xlu1 %1704, %v1910_v6  }
  0x46   : > { %1705 = vset.pattern.permute.xlu1 %v3069_v0 }
  0x47   : > { %1093 = vperm.xlu1 %1705, %v1925_v9  }
  0x4b   : > { %1707 = vset.pattern.permute.xlu1 %v3067_v16 }
  0x4c   : > { %940 = vperm.xlu1 %1707, %v1901_v5  }
  0x50   : > { %1029 = vperm.xlu1 %1707, %v1910_v6  }
  0x54   : > { %1708 = vset.pattern.permute.xlu1 %v3069_v0 }
  0x55   : > { %1181 = vperm.xlu1 %1708, %v1993_v17  }
  0x59   : > { %1709 = vset.pattern.permute.xlu1 %v3059_v1 }
  0x5a   : > { %1189 = vperm.xlu1 %1709, %v1993_v17  }
  0x5e   : > { %1710 = vset.pattern.permute.xlu1 %v3063_v18 }
  0x5f   : > { %1037 = vperm.xlu1 %1710, %v1910_v6  }
  0x63   : > { %1711 = vset.pattern.permute.xlu1 %v3067_v16 }
  0x64   : > { %1117 = vperm.xlu1 %1711, %v1925_v9  }
  0x68   : > { %1713 = vset.pattern.permute.xlu1 %v3062_v19 }
  0x86   : > { %v552_v35 = vpop.permute.xlu1 %551  ;;  %v422_v36 = vpop.permute.xlu0 %421 }
  0x87   : > { %v429_v41 = vsel %vm3054_vm8, 0.0, %v422_v36 }
  0x88   : > { %v2072_v51 = vsel %vm443_vm11, %v429_v41, 0.0  ;;  %vm2143_vm11 = vcmp.eq.s32.totalorder %v464_v22, 1 }
  0x89   : > { %3174 = vst [vmem:[#allocation8_spill] sm:$0xff] %v2072_v51 }
  0x8a   : > { %v554_v42 = vpop.permute.xlu1 %553  ;;  %v424_v43 = vpop.permute.xlu0 %423 }
  0x8b   : > { %v556_v48 = vsel %vm3055_vm14, %v552_v35, %v554_v42  ;;  %v559_v49 = vsel %vm3055_vm14, %v554_v42, 0.0  ;;  %v426_v50 = vsel %vm3054_vm8, %v422_v36, %v424_v43  ;;  %v3187_v36 = vmov 0 }
  0x8c   : > { %v2074_v52 = vsel %vm444_vm0, %v426_v50, 0.0  ;;  %v2076_v53 = vsel %vm571_vm9, %v556_v48, 0.0  ;;  %v2078_v54 = vsel %vm572_vm5, %v559_v49, 0.0  ;;  %vm2118_vm5 = vcmp.eq.s32.totalorder %v412_v63, 1 }
  0x8d   : > { %3175 = vst [vmem:[#allocation9_spill] sm:$0xff] %v2074_v52  ;;  %3176 = vst [vmem:[#allocation10_spill] sm:$0xff] %v2076_v53  ;;  %v623_v55 = vsel %vm2053_vm10, %v2072_v51, %v2076_v53  ;;  %v624_v56 = vsel %vm2061_vm4, %v2074_v52, %v2078_v54  ;;  %v3179_v26 = vsel %vm2118_vm5, 4294967295, %v3178_v26  ;;  %vm2122_vm9 = vcmp.eq.s32.totalorder %v416_v8, 1 }
  0x8e   : > { %3177 = vst [vmem:[#allocation11_spill] sm:$0xff] %v2078_v54  ;;  %v2088_v57 = vpop.permute.xlu1 %475  ;;  %v2091_v58 = vmul.f32 %v2059_v45, %v623_v55  ;;  %627 = vrot.lane.b32.xlu0 %v623_v55, %s1770_s11  ;;  %629 = vrot.lane.b32.xlu1 %v624_v56, %s1770_s11  ;;  %v2096_v59 = vmul.f32 %v2067_v47, %v624_v56  ;;  %v2098_v60 = vpop.permute.xlu0 %473  ;;  %3180 = vst [vmem:[#allocation12_spill] sm:$0xff] %v3179_v26  ;;  %v3182_v28 = vsel %vm2122_vm9, 4294967295, %v3181_v28 }
  0x8f   : > { %3183 = vst [vmem:[#allocation13_spill] sm:$0xff] %v3182_v28  ;;  %v3188_v36 = vsel %vm2143_vm11, 4294967295, %v3187_v36  ;;  %vm2147_vm0 = vcmp.eq.s32.totalorder %v468_v25, 1  ;;  %v2158_v42 = vsel %vm1981_vm1, 1, %v3069_v0  ;;  %vm3052_vm1 = vcmask 908288  }
  0x90   : > { %3189 = vst [vmem:[#allocation17_spill] sm:$0xff] %v3188_v36  ;;  %v3191_v14 = vsel %vm2147_vm0, 4294967295, %v3190_v14  ;;  %3193 = vst [vmem:[#allocation19_spill] sm:$0xff] %v2158_v42  ;;  %v590_v15 = vrot.slane %v2158_v42, %v2022_v23  ;;  %vm766_vm5 = vcmp.lt.s32.totalorder %v1915_v7, 14  ;;  %vm839_vm4 = vcmp.lt.s32.totalorder %v1896_v4, 14 }
  0x91   : > { %3192 = vst [vmem:[#allocation18_spill] sm:$0xff] %v3191_v14  ;;  %v3248_v42 = vmov 0  }
  0x92   : > { %v2107_v13 = vpop.permute.xlu1 %502  ;;  %635 = vrot.lane.b32.xlu0 %v623_v55, %s1771_s12  ;;  %637 = vrot.lane.b32.xlu1 %v624_v56, %s1771_s12  ;;  %v2111_v20 = vpop.permute.xlu0 %500  ;;  %v3196_v55 = vmov 0 }
  0x96   : > { %1197 = vperm.xlu0 %1706, %v1993_v17   ;;  %957 = vperm.xlu1 %1713, %v1901_v5   ;;  %v395_v29 = vpop.permute.xlu1 %394  ;;  %v393_v12 = vpop.permute.xlu0 %392 }
  0x97   : > { %v2133_v32 = vsel %vm396_vm6, %v393_v12, %v395_v29  ;;  %v2135_v33 = vsel %vm396_vm6, 0.0, %v393_v12  ;;  %vm2171_vm6 = vcmp.eq.s32.totalorder %v542_v37, 1  ;;  %v3064_v29 = vmov 6  }
  0x98   : > { %3185 = vst [vmem:[#allocation15_spill] sm:$0xff] %v2133_v32  ;;  %3186 = vst [vmem:[#allocation16_spill] sm:$0xff] %v2135_v33  ;;  %v3197_v55 = vsel %vm2171_vm6, 4294967295, %v3196_v55  ;;  %vm3208_vm6 = vcmp.lt.s32.totalorder %v1915_v7, 17 }
  0x99   : > { %3198 = vst [vmem:[#allocation22_spill] sm:$0xff] %v3197_v55 }
  0x9a   : > { %1712 = vset.pattern.permute.xlu0 %v3063_v18  ;;  %1045 = vperm.xlu1 %1713, %v1910_v6   ;;  %v450_v38 = vpop.permute.xlu1 %449  ;;  %v448_v41 = vpop.permute.xlu0 %447 }
  0x9b   : > { %948 = vperm.xlu0 %1712, %v1901_v5   ;;  %v2161_v43 = vsel %vm451_vm12, %v448_v41, %v450_v38  ;;  %v2163_v48 = vsel %vm451_vm12, 0.0, %v448_v41  ;;  %vm2189_vm12 = vcmp.eq.s32.totalorder %v590_v15, 1  ;;  %v3061_v38 = vmov 7  }
  0x9c   : > { %3194 = vst [vmem:[#allocation20_spill] sm:$0xff] %v2161_v43  ;;  %3195 = vst [vmem:[#allocation21_spill] sm:$0xff] %v2163_v48  ;;  %v3202_v10 = vsel %vm2189_vm12, 4294967295, %v3201_v10  ;;  %v3060_v41 = vmov 8  }
  0x9d   : > { %3203 = vst [vmem:[#allocation25_spill] sm:$0xff] %v3202_v10 }
  0x9e   : > { %1714 = vset.pattern.permute.xlu1 %v3067_v16  ;;  %v2178_v56 = vpop.permute.xlu1 %526  ;;  %v525_v61 = vpop.permute.xlu0 %524 }
  0x9f   : > { %3199 = vst [vmem:[#allocation23_spill] sm:$0xff] %v2178_v56  ;;  %1125 = vperm.xlu0 %1712, %v1925_v9   ;;  %1205 = vperm.xlu1 %1714, %v1993_v17   ;;  %v2184_v63 = vsel %vm3053_vm15, %v525_v61, %v2178_v56  ;;  %vm483_vm15 = vcmp.lt.s32.totalorder %v1896_v4, 16 }
  0xa0   : > { %3200 = vst [vmem:[#allocation24_spill] sm:$0xff] %v2184_v63 }
  0xa2   : > { %v2193_v22 = vpop.permute.xlu1 %577  ;;  %v576_v25 = vpop.permute.xlu0 %575 }
  0xa3   : > { %3204 = vst [vmem:[#allocation26_spill] sm:$0xff] %v2193_v22  ;;  %1715 = vset.pattern.permute.xlu1 %v3064_v29  ;;  %v2198_v12 = vsel %vm3052_vm1, %v576_v25, %v2193_v22  ;;  %1716 = vset.pattern.permute.xlu0 %v3064_v29  ;;  %vm482_vm1 = vcmp.ge.s32.totalorder %v1896_v4, 0 }
  0xa4   : > { %3205 = vst [vmem:[#allocation27_spill] sm:$0xff] %v2198_v12  ;;  %965 = vperm.xlu1 %1715, %v1901_v5   ;;  %1053 = vperm.xlu0 %1716, %v1910_v6   ;;  %vm2243_vm8 = vmand %vm482_vm1, %vm483_vm15  ;;  %vm3209_vm15 = vcmp.lt.s32.totalorder %v1915_v7, 15 }
  0xa5   : > { %vm485_vm14 = vmand %vm2243_vm8, %vm404_vm3  ;;  %vm3086_vm3 = vcmask 7168  }
  0xa6   : > { %vm509_vm12 = vmand %vm2243_vm8, %vm456_vm7  ;;  %vm3087_vm7 = vcmask 1039360  }
  0xa7   : > { %vm486_vm0 = vmand %vm485_vm14, %vm3208_vm6  ;;  %v505_v39 = vsel %vm3087_vm7, %v2111_v20, %v2107_v13 }
  0xa8   : > { %1717 = vset.pattern.permute.xlu1 %v3062_v19  ;;  %1721 = vset.pattern.permute.xlu0 %v3062_v19  ;;  %vm510_vm1 = vmand %vm509_vm12, %vm3209_vm15  ;;  %v487_v35 = vsel %vm486_vm0, 1, %v3069_v0 }
  0xa9   : > { %1133 = vperm.xlu1 %1717, %v1925_v9   ;;  %1221 = vperm.xlu0 %1721, %v1993_v17   ;;  %v511_v34 = vsel %vm510_vm1, 1, %v3069_v0 }
  0xaa   : > { %v519_v19 = vrot.slane %v511_v34, %v2031_v27 }
  0xac   : > { %vm521_vm6 = vcmp.eq.s32.totalorder %v519_v19, 1 }
  0xad   : > { %1718 = vset.pattern.permute.xlu1 %v3063_v18  ;;  %1722 = vset.pattern.permute.xlu0 %v3061_v38  ;;  %v515_v18 = vrot.slane %v511_v34, %v2022_v23  ;;  %v481_v34 = vsel %vm3086_vm3, 0.0, %v2098_v60 }
  0xae   : > { %1213 = vperm.xlu1 %1718, %v1993_v17   ;;  %973 = vperm.xlu0 %1722, %v1901_v5  }
  0xaf   : > { %vm520_vm12 = vcmp.eq.s32.totalorder %v515_v18, 1  ;;  %v3211_v18 = vmov 0 }
  0xb2   : > { %1719 = vset.pattern.permute.xlu1 %v3061_v38  ;;  %1149 = vperm.xlu0 %1722, %v1925_v9   ;;  %v495_v38 = vrot.slane %v487_v35, %v2031_v27 }
  0xb3   : > { %1061 = vperm.xlu1 %1719, %v1910_v6   ;;  %v2224_v15 = vpop.permute.xlu1 %916  ;;  %v2263_v49 = vpop.permute.xlu0 %924 }
  0xb4   : > { %vm497_vm0 = vcmp.eq.s32.totalorder %v495_v38, 1 }
  0xb6   : > { %1237 = vperm.xlu0 %1722, %v1993_v17  }
  0xb7   : > { %1720 = vset.pattern.permute.xlu1 %v3064_v29  ;;  %v2228_v61 = vpop.permute.xlu1 %1005  ;;  %v2276_v11 = vpop.permute.xlu0 %1101 }
  0xb8   : > { %1141 = vperm.xlu1 %1720, %v1925_v9  }
  0xba   : > { %1726 = vset.pattern.permute.xlu0 %v3060_v41 }
  0xbc   : > { %1723 = vset.pattern.permute.xlu1 %v3060_v41  ;;  %v2232_v25 = vpop.permute.xlu1 %1013  ;;  %v2309_v20 = vpop.permute.xlu0 %932 }
  0xbd   : > { %981 = vperm.xlu1 %1723, %v1901_v5  }
  0xc0   : > { %v2329_v47 = vpop.permute.xlu0 %1109 }
  0xc1   : > { %1069 = vperm.xlu1 %1723, %v1910_v6   ;;  %v2235_v37 = vpop.permute.xlu1 %1021 }
  0xc5   : > { %1724 = vset.pattern.permute.xlu1 %v3064_v29 }
  0xc6   : > { %1229 = vperm.xlu1 %1724, %v1993_v17   ;;  %v2237_v5 = vpop.permute.xlu1 %1093 }
  0xca   : > { %1725 = vset.pattern.permute.xlu1 %v3060_v41  ;;  %v491_v41 = vrot.slane %v487_v35, %v2022_v23  ;;  %v478_v35 = vsel %vm3086_vm3, %v2098_v60, %v2088_v57  ;;  %v3214_v57 = vmov 0 }
  0xcb   : > { %1157 = vperm.xlu1 %1725, %v1925_v9   ;;  %v2241_v6 = vpop.permute.xlu1 %940  ;;  %v2303_v38 = vsel %vm497_vm0, %v478_v35, 0.0  ;;  %vm712_vm0 = vcmp.lt.s32.totalorder %v1896_v4, 18 }
  0xcc   : > { %vm496_vm14 = vcmp.eq.s32.totalorder %v491_v41, 1  ;;  %3218 = vst [vmem:[#allocation31_spill] sm:$0xff] %v2303_v38 }
  0xcd   : > { %v2301_v60 = vsel %vm496_vm14, %v481_v34, 0.0  ;;  %vm711_vm14 = vcmp.ge.s32.totalorder %v1896_v4, 2 }
  0xce   : > { %3217 = vst [vmem:[#allocation30_spill] sm:$0xff] %v2301_v60 }
  0xcf   : > { %1727 = vset.pattern.permute.xlu1 %v3059_v1  ;;  %v2251_v9 = vpop.permute.xlu1 %1029  ;;  %v599_v1 = vsel %vm2038_vm13, 1, %v3069_v0  ;;  %v508_v0 = vsel %vm3087_vm7, %v2107_v13, 0.0  ;;  %v2307_v13 = vsel %vm520_vm12, %v505_v39, 0.0  ;;  %vm3096_vm12 = vcmp.ge.s32.totalorder %v1915_v7, 2 }
  0xd0   : > { %v607_v16 = vrot.slane %v599_v1, %v2031_v27  ;;  %v603_v62 = vrot.slane %v599_v1, %v2022_v23  ;;  %v3210_v1 = vmov 1.0   ;;  %v2305_v41 = vsel %vm521_vm6, %v508_v0, 0.0  ;;  %3220 = vst [vmem:[#allocation33_spill] sm:$0xff] %v2307_v13  ;;  %vm713_vm6 = vmand %vm711_vm14, %vm712_vm0 }
  0xd1   : > { %v387_v19 = vsel %vm2024_vm2, -1.0, %v3210_v1  ;;  %3219 = vst [vmem:[#allocation32_spill] sm:$0xff] %v2305_v41  ;;  %vm838_vm0 = vcmp.ge.s32.totalorder %v1896_v4, 4294967294 }
  0xd2   : > { %vm2293_vm15 = vcmp.eq.s32.totalorder %v607_v16, 1  ;;  %vm2297_vm1 = vcmp.eq.s32.totalorder %v603_v62, 1  ;;  %v2312_v1 = vrot.slane %v387_v19, %v2031_v27  ;;  %v2315_v16 = vrot.slane %v387_v19, %v2022_v23 }
  0xd3   : > { %v3212_v18 = vsel %vm2293_vm15, 4294967295, %v3211_v18  ;;  %v3215_v57 = vsel %vm2297_vm1, 4294967295, %v3214_v57  ;;  %v611_v62 = vsel %vm2293_vm15, %v2303_v38, %v2305_v41  ;;  %v610_v0 = vsel %vm2297_vm1, %v2301_v60, %v2307_v13 }
  0xd4   : > { %v2261_v50 = vpop.permute.xlu1 %1181  ;;  %3213 = vst [vmem:[#allocation28_spill] sm:$0xff] %v3212_v18  ;;  %3216 = vst [vmem:[#allocation29_spill] sm:$0xff] %v3215_v57  ;;  %v657_v35 = vmul.f32 %v2312_v1, %v611_v62  ;;  %v656_v34 = vmul.f32 %v2315_v16, %v610_v0  ;;  %v389_v45 = vmul.f32 %v2050_v40, %v387_v19 }
  0xd5   : > { %3221 = vst [vmem:[#allocation34_spill] sm:$0xff] %v2312_v1  ;;  %3222 = vst [vmem:[#allocation35_spill] sm:$0xff] %v2315_v16 }
  0xd6   : > { %v660_v12 = vcombine.low %v656_v34, %v657_v35  ;;  %v2333_v53 = vrot.slane %v389_v45, %v2031_v27  ;;  %v2336_v22 = vrot.slane %v389_v45, %v2022_v23 }
  0xd8   : > { %3223 = vst [vmem:[#allocation36_spill] sm:$0xff] %v2333_v53  ;;  %3224 = vst [vmem:[#allocation37_spill] sm:$0xff] %v2336_v22  ;;  %v662_v63 = vadd.f32 %v660_v12, %v1863_v2  ;;  %v3225_v12 = vcombine.low %v2091_v58, %v2096_v59 }
  0xd9   : > { %v2274_v29 = vpop.permute.xlu1 %1189 }
  0xde   : > { %v1038_v21 = vpop.permute.xlu1 %1037 }
  0xe3   : > { %v2325_v39 = vpop.permute.xlu1 %1117 }
 0x100   : > { %v630_v10 = vpop.permute.xlu1 %629  ;;  %v628_v54 = vpop.permute.xlu0 %627 }
 0x101   : > { %v631_v62 = vsel %vm3086_vm3, %v628_v54, %v630_v10  ;;  %v634_v0 = vsel %vm3086_vm3, 0.0, %v628_v54  ;;  %v680_v10 = vadd.f32 %v3225_v12, %v662_v63  ;;  %vm3109_vm3 = vcmp.ge.s32.totalorder %v1915_v7, 4294967294 }
 0x102   : > { %vm765_vm9 = vmand %vm713_vm6, %vm3109_vm3 }
 0x104   : > { %v638_v55 = vpop.permute.xlu1 %637  ;;  %v636_v41 = vpop.permute.xlu0 %635 }
 0x105   : > { %v642_v1 = vsel %vm3087_vm7, %v638_v55, 0.0  ;;  %v639_v40 = vsel %vm3087_vm7, %v636_v41, %v638_v55  ;;  %vm715_vm7 = vmand %vm713_vm6, %vm3096_vm12  ;;  %vm3235_vm12 = vcmp.lt.s32.totalorder %v1915_v7, 16 }
 0x106   : > { %v644_v19 = vsel %vm2293_vm15, %v631_v62, %v642_v1  ;;  %v643_v35 = vsel %vm2297_vm1, %v634_v0, %v639_v40  ;;  %vm3102_vm15 = vcmp.lt.s32.totalorder %v1915_v7, 18  ;;  %vm3233_vm1 = vcmp.ge.s32.totalorder %v1915_v7, 0 }
 0x107   : > { %v693_v45 = vmul.f32 %v2333_v53, %v644_v19  ;;  %v692_v2 = vmul.f32 %v2336_v22, %v643_v35  ;;  %vm740_vm11 = vmand %vm713_vm6, %vm3233_vm1 }
 0x108   : > { %vm717_vm14 = vmand %vm715_vm7, %vm3102_vm15  ;;  %vm3241_vm7 = vcmp.ge.s32.totalorder %v1915_v7, 2 }
 0x109   : > { %v696_v34 = vcombine.low %v692_v2, %v693_v45  ;;  %vm741_vm10 = vmand %vm740_vm11, %vm3235_vm12  ;;  %vm3245_vm12 = vcmp.lt.s32.totalorder %v1915_v7, 18  ;;  %v718_v56 = vsel %vm717_vm14, 1, %v3248_v42 }
 0x10a   : > { %vm2434_vm1 = vmand %vm765_vm9, %vm766_vm5  ;;  %v742_v8 = vsel %vm741_vm10, 1, %v3248_v42  ;;  %v722_v43 = vrot.slane %v718_v56, %v2022_v23  ;;  %v726_v14 = vrot.slane %v718_v56, %v2031_v27  ;;  %vm3257_vm10 = vcmp.ge.s32.totalorder %v1915_v7, 4294967294 }
 0x10b   : > { %v698_v54 = vadd.f32 %v696_v34, %v680_v10  ;;  %vm2438_vm6 = vmand %vm838_vm0, %vm839_vm4  ;;  %v746_v48 = vrot.slane %v742_v8, %v2022_v23  ;;  %v2492_v36 = vsel %vm2434_vm1, 1, %v3248_v42  ;;  %vm706_vm1 = vcmask 277504  }
 0x10c   : > { %vm790_vm15 = vmand %vm2243_vm8, %vm3241_vm7  ;;  %v750_v18 = vrot.slane %v742_v8, %v2031_v27  ;;  %v772_v33 = vrot.slane %v2492_v36, %v2022_v23 }
 0x10d   : > { %v2352_v16 = vmul.f32 0.5, %v698_v54  ;;  %vm814_vm11 = vmand %vm2243_vm8, %vm3109_vm3 }
 0x10e   : > { %vm3244_vm9 = vmmov %vm3241_vm7 }
 0x10f   : > { %880 = vrot.lane.b32.xlu1 %v2352_v16, %s1784_s15  ;;  %702 = vrot.lane.b32.xlu0 %v2352_v16, %s1785_s16  ;;  %v2358_v55 = vcombine.high %v2352_v16, %v2352_v16  ;;  %v2361_v41 = vmul.f32 %v1038_v21, %v2352_v16  ;;  %vm841_vm4 = vmand %vm2438_vm6, %vm3244_vm9 }
 0x110   : > { %vm2460_vm0 = vmand %vm790_vm15, %vm3245_vm12  ;;  %vm3254_vm15 = vcmp.ge.s32.totalorder %v1915_v7, 0 }
 0x111   : > { %v2364_v58 = vmul.f32 %v1038_v21, %v2358_v55  ;;  %v3226_v21 = vmov 3   ;;  %vm2468_vm8 = vmand %vm814_vm11, %vm766_vm5  ;;  %vm1792_vm11 = vmmov 1   ;;  %v2524_v26 = vsel %vm2460_vm0, 1, %v3248_v42 }
 0x112   : > { %vm3251_vm7 = vmmov %vm3245_vm12  ;;  %v2529_v52 = vsel %vm2468_vm8, 1, %v3248_v42  ;;  %vm735_vm0 = vcmask 261120  }
 0x113   : > { %731 = vrot.lane.b32.xlu0 %v2352_v16, %s1786_s17  ;;  %704 = vrot.lane.b32.xlu1 %v2358_v55, %s1785_s16  ;;  %vm2474_vm3 = vmand %vm841_vm4, %vm3251_vm7 }
 0x114   : > { %vm2482_vm9 = vmand %vm2438_vm6, %vm3254_vm15  ;;  %vm2535_vm15 = vcmp.eq.s32.totalorder %v722_v43, 1  ;;  %v2560_v43 = vsel %vm2474_vm3, 1, %v3248_v42  ;;  %vm2589_vm3 = vcmp.eq.s32.totalorder %v750_v18, 1 }
 0x115   : > { %v2382_v59 = vpop.permute.xlu1 %957  ;;  %v2390_v0 = vpop.permute.xlu0 %1197  ;;  %vm2498_vm14 = vmand %vm2438_vm6, %vm3257_vm10  ;;  %vm3266_vm6 = vcmp.lt.s32.totalorder %v1915_v7, 16  ;;  %vm2539_vm10 = vcmp.eq.s32.totalorder %v726_v14, 1  ;;  %v776_v14 = vrot.slane %v2492_v36, %v2031_v27  ;;  %v796_v7 = vrot.slane %v2524_v26, %v2022_v23 }
 0x116   : > { %vm2508_vm4 = vmxor %vm2024_vm2, %vm1792_vm11 }
 0x117   : > { %755 = vrot.lane.b32.xlu0 %v2352_v16, %s1787_s18  ;;  %733 = vrot.lane.b32.xlu1 %v2358_v55, %s1786_s17  ;;  %vm2514_vm12 = vmxor %vm2038_vm13, %vm1792_vm11  ;;  %vm2543_vm11 = vcmp.eq.s32.totalorder %v746_v48, 1 }
 0x118   : > { %vm866_vm7 = vmand %vm2482_vm9, %vm3266_vm6  ;;  %vm759_vm9 = vcmask 244736  }
 0x119   : > { %v2384_v63 = vpop.permute.xlu1 %1045  ;;  %vm2551_vm8 = vmand %vm2498_vm14, %vm766_vm5  ;;  %v2573_v36 = vsel %vm866_vm7, 1, %v3248_v42  ;;  %vm2593_vm14 = vcmp.eq.s32.totalorder %v772_v33, 1 }
 0x11a   : > { %v2394_v19 = vpop.permute.xlu0 %948  ;;  %vm906_vm6 = vmand %vm2508_vm4, %vm2514_vm12 }
 0x11b   : > { %781 = vrot.lane.b32.xlu0 %v2352_v16, %s1788_s19  ;;  %757 = vrot.lane.b32.xlu1 %v2358_v55, %s1787_s18  ;;  %vm908_vm5 = vmand %vm2508_vm4, %vm2038_vm13  ;;  %v2581_v60 = vmul.f32 %v2394_v19, %v2352_v16  ;;  %v2585_v38 = vmul.f32 %v2394_v19, %v2358_v55  ;;  %v2623_v3 = vsel %vm906_vm6, 1.0, %v1793_v44  ;;  %vm2680_vm4 = vcmp.eq.s32.totalorder %v796_v7, 1 }
 0x11c   : > { %vm910_vm7 = vmand %vm2024_vm2, %vm2514_vm12  ;;  %3281 = vst [vmem:[#allocation52_spill] sm:$0xff] %v2623_v3  ;;  %vm809_vm12 = vcmask 1031168  }
 0x11e   : > { %v2386_v1 = vpop.permute.xlu1 %1205  ;;  %v2398_v35 = vpop.permute.xlu0 %1125 }
 0x11f   : > { %805 = vrot.lane.b32.xlu0 %v2352_v16, %s1789_s20  ;;  %783 = vrot.lane.b32.xlu1 %v2358_v55, %s1788_s19  ;;  %v2610_v19 = vmul.f32 %v2398_v35, %v2352_v16  ;;  %v2614_v33 = vmul.f32 %v2398_v35, %v2358_v55  ;;  %v2649_v35 = vsel %vm908_vm5, 1.0, %v1793_v44 }
 0x120   : > { %3282 = vst [vmem:[#allocation53_spill] sm:$0xff] %v2649_v35 }
 0x123   : > { %829 = vrot.lane.b32.xlu0 %v2352_v16, %s1790_s21  ;;  %807 = vrot.lane.b32.xlu1 %v2358_v55, %s1789_s20  ;;  %v2388_v62 = vpop.permute.xlu1 %965  ;;  %v2402_v2 = vpop.permute.xlu0 %1053 }
 0x124   : > { %3227 = vst [vmem:[#allocation38_spill] sm:$0xff] %v2388_v62  ;;  %3229 = vst [vmem:[#allocation40_spill] sm:$0xff] %v2402_v2 }
 0x127   : > { %856 = vrot.lane.b32.xlu0 %v2352_v16, %s1791_s22  ;;  %831 = vrot.lane.b32.xlu1 %v2358_v55, %s1790_s21 }
 0x128   : > { %v2392_v40 = vpop.permute.xlu1 %1133  ;;  %v2408_v10 = vpop.permute.xlu0 %1221 }
 0x129   : > { %3231 = vst [vmem:[#allocation42_spill] sm:$0xff] %v2408_v10 }
 0x12b   : > { %1245 = vperm.xlu0 %1726, %v1993_v17   ;;  %858 = vrot.lane.b32.xlu1 %v2358_v55, %s1791_s22 }
 0x12d   : > { %v2396_v17 = vpop.permute.xlu1 %1213  ;;  %v2422_v54 = vpop.permute.xlu0 %973 }
 0x12e   : > { %3234 = vst [vmem:[#allocation44_spill] sm:$0xff] %v2422_v54 }
 0x12f   : > { %882 = vrot.lane.b32.xlu1 %v2358_v55, %s1784_s15  ;;  %1729 = vset.pattern.permute.xlu0 %v3226_v21 }
 0x131   : > { %v2452_v57 = vpop.permute.xlu0 %1149 }
 0x132   : > { %v2400_v45 = vpop.permute.xlu1 %1061  ;;  %3243 = vst [vmem:[#allocation47_spill] sm:$0xff] %v2452_v57 }
 0x133   : > { %3228 = vst [vmem:[#allocation39_spill] sm:$0xff] %v2400_v45  ;;  %v3293_v45 = vrot.slane %v2529_v52, %v2022_v23 }
 0x135   : > { %v2504_v28 = vpop.permute.xlu0 %1237 }
 0x136   : > { %3261 = vst [vmem:[#allocation49_spill] sm:$0xff] %v2504_v28 }
 0x137   : > { %v2404_v12 = vpop.permute.xlu1 %1141 }
 0x138   : > { %3230 = vst [vmem:[#allocation41_spill] sm:$0xff] %v2404_v12 }
 0x13c   : > { %v2411_v34 = vpop.permute.xlu1 %981 }
 0x13d   : > { %3232 = vst [vmem:[#allocation43_spill] sm:$0xff] %v2411_v34  ;;  %v2638_v34 = vmul.f32 %v2396_v17, %v2352_v16 }
 0x140   : > { %v2430_v53 = vpop.permute.xlu1 %1069 }
 0x141   : > { %3236 = vst [vmem:[#allocation45_spill] sm:$0xff] %v2430_v53  ;;  %v2653_v53 = vmul.f32 %v2396_v17, %v2358_v55 }
 0x143   : > { %3283 = vst [vmem:[#allocation54_spill] sm:$0xff] %v2653_v53 }
 0x145   : > { %v2450_v4 = vpop.permute.xlu1 %1229 }
 0x146   : > { %3242 = vst [vmem:[#allocation46_spill] sm:$0xff] %v2450_v4 }
 0x14a   : > { %v2502_v32 = vpop.permute.xlu1 %1157 }
 0x14b   : > { %3260 = vst [vmem:[#allocation48_spill] sm:$0xff] %v2502_v32  ;;  %v2602_v32 = vsel %vm2551_vm8, 1, %v3248_v42  ;;  %vm912_vm8 = vmand %vm2024_vm2, %vm2038_vm13  ;;  %vm785_vm13 = vcmask 15360   ;;  %vm2676_vm2 = vcmp.eq.s32.totalorder %v776_v14, 1 }
 0x14c   : > { %3280 = vst [vmem:[#allocation51_spill] sm:$0xff] %v2602_v32  ;;  %v2664_v31 = vsel %vm912_vm8, 1.0, %v1793_v44 }
 0x14d   : > { %3285 = vst [vmem:[#allocation56_spill] sm:$0xff] %v2664_v31 }
 0x181   : > { %v2587_v30 = vpop.permute.xlu1 %880  ;;  %v703_v21 = vpop.permute.xlu0 %702 }
 0x182   : > { %3275 = vst [vmem:[#allocation50_spill] sm:$0xff] %v2587_v30  ;;  %v710_v42 = vsel %vm706_vm1, 0.0, %v703_v21  ;;  %v2660_v30 = vsel %vm910_vm7, 1.0, %v1793_v44 }
 0x183   : > { %3284 = vst [vmem:[#allocation55_spill] sm:$0xff] %v2660_v30  ;;  %v729_v28 = vsel %vm2535_vm15, %v710_v42, 0.0  ;;  %vm2731_vm15 = vcmp.eq.s32.totalorder %v3293_v45, 1 }
 0x184   : > { %v1184_v8 = vmul.f32 %v2261_v50, %v729_v28 }
 0x185   : > { %v705_v18 = vpop.permute.xlu1 %704  ;;  %v732_v16 = vpop.permute.xlu0 %731 }
 0x186   : > { %v707_v55 = vsel %vm706_vm1, %v703_v21, %v705_v18  ;;  %v739_v17 = vsel %vm735_vm0, 0.0, %v732_v16  ;;  %v919_v18 = vmul.f32 %v2224_v15, %v729_v28 }
 0x187   : > { %v730_v22 = vsel %vm2539_vm10, %v707_v55, 0.0  ;;  %v753_v57 = vsel %vm2543_vm11, %v739_v17, 0.0  ;;  %v1008_v55 = vmul.f32 %v2228_v61, %v729_v28  ;;  %v1096_v17 = vmul.f32 %v2237_v5, %v729_v28 }
 0x188   : > { %v920_v51 = vmul.f32 %v2224_v15, %v730_v22  ;;  %v927_v13 = vmul.f32 %v2263_v49, %v753_v57  ;;  %v1009_v7 = vmul.f32 %v2228_v61, %v730_v22  ;;  %v1016_v31 = vmul.f32 %v2232_v25, %v753_v57 }
 0x189   : > { %v734_v21 = vpop.permute.xlu1 %733  ;;  %v756_v24 = vpop.permute.xlu0 %755  ;;  %v1104_v30 = vmul.f32 %v2276_v11, %v753_v57  ;;  %v1192_v35 = vmul.f32 %v2274_v29, %v753_v57  ;;  %v1097_v28 = vmul.f32 %v2237_v5, %v730_v22  ;;  %v1185_v3 = vmul.f32 %v2261_v50, %v730_v22 }
 0x18a   : > { %v736_v56 = vsel %vm735_vm0, %v732_v16, %v734_v21  ;;  %v763_v14 = vsel %vm759_vm9, 0.0, %v756_v24  ;;  %v3290_v21 = vrot.slane %v2524_v26, %v2031_v27  ;;  %v929_v46 = vadd.f32 %v927_v13, %v919_v18 }
 0x18b   : > { %v754_v15 = vsel %vm2589_vm3, %v736_v56, 0.0  ;;  %v779_v16 = vsel %vm2593_vm14, %v763_v14, 0.0  ;;  %v1106_v13 = vadd.f32 %v1104_v30, %v1096_v17  ;;  %v1194_v18 = vadd.f32 %v1192_v35, %v1184_v8 }
 0x18c   : > { %vm2717_vm1 = vcmp.eq.s32.totalorder %v3290_v21, 1  ;;  %v928_v57 = vmul.f32 %v2263_v49, %v754_v15  ;;  %v1017_v5 = vmul.f32 %v2232_v25, %v754_v15  ;;  %v1105_v50 = vmul.f32 %v2276_v11, %v754_v15 }
 0x18d   : > { %v1193_v48 = vmul.f32 %v2274_v29, %v754_v15  ;;  %v758_v56 = vpop.permute.xlu1 %757  ;;  %v782_v22 = vpop.permute.xlu0 %781  ;;  %v935_v14 = vmul.f32 %v2309_v20, %v779_v16  ;;  %v1024_v26 = vmul.f32 %v2235_v37, %v779_v16  ;;  %v1112_v21 = vmul.f32 %v2329_v47, %v779_v16 }
 0x18e   : > { %v3296_v11 = vrot.slane %v2529_v52, %v2031_v27  ;;  %v1018_v25 = vadd.f32 %v1016_v31, %v1008_v55  ;;  %v1200_v15 = vmul.f32 %v2390_v0, %v779_v16  ;;  %v930_v54 = vadd.f32 %v928_v57, %v920_v51 }
 0x18f   : > { %v1019_v4 = vadd.f32 %v1017_v5, %v1009_v7  ;;  %v1107_v12 = vadd.f32 %v1105_v50, %v1097_v28  ;;  %v1195_v2 = vadd.f32 %v1193_v48, %v1185_v3  ;;  %v937_v45 = vadd.f32 %v935_v14, %v929_v46 }
 0x190   : > { %vm2738_vm10 = vcmp.eq.s32.totalorder %v3296_v11, 1  ;;  %v1026_v62 = vadd.f32 %v1024_v26, %v1018_v25  ;;  %v760_v32 = vsel %vm759_vm9, %v756_v24, %v758_v56  ;;  %v789_v10 = vsel %vm785_vm13, 0.0, %v782_v22 }
 0x191   : > { %v784_v52 = vpop.permute.xlu1 %783  ;;  %v1114_v11 = vadd.f32 %v1112_v21, %v1106_v13  ;;  %v780_v53 = vsel %vm2676_vm2, %v760_v32, 0.0  ;;  %v803_v30 = vsel %vm2680_vm4, %v789_v10, 0.0  ;;  %v806_v51 = vpop.permute.xlu0 %805  ;;  %v1202_v10 = vadd.f32 %v1200_v15, %v1194_v18 }
 0x192   : > { %v786_v35 = vsel %vm785_vm13, %v782_v22, %v784_v52  ;;  %v936_v31 = vmul.f32 %v2309_v20, %v780_v53  ;;  %v1025_v3 = vmul.f32 %v2235_v37, %v780_v53  ;;  %v1113_v8 = vmul.f32 %v2329_v47, %v780_v53 }
 0x193   : > { %v1201_v24 = vmul.f32 %v2390_v0, %v780_v53  ;;  %v943_v7 = vmul.f32 %v2241_v6, %v803_v30  ;;  %v1032_v55 = vmul.f32 %v2251_v9, %v803_v30  ;;  %v1120_v32 = vmul.f32 %v2325_v39, %v803_v30 }
 0x194   : > { %v1208_v44 = vmul.f32 %v2386_v1, %v803_v30  ;;  %v938_v42 = vadd.f32 %v936_v31, %v930_v54  ;;  %v1027_v17 = vadd.f32 %v1025_v3, %v1019_v4  ;;  %v1115_v28 = vadd.f32 %v1113_v8, %v1107_v12 }
 0x195   : > { %v808_v20 = vpop.permute.xlu1 %807  ;;  %vm833_vm0 = vcmask 801792   ;;  %vm860_vm11 = vcmask 785408   ;;  %v1203_v37 = vadd.f32 %v1201_v24, %v1195_v2  ;;  %v945_v47 = vadd.f32 %v943_v7, %v937_v45  ;;  %v830_v26 = vpop.permute.xlu0 %829 }
 0x196   : > { %v1034_v16 = vadd.f32 %v1032_v55, %v1026_v62  ;;  %v1122_v53 = vadd.f32 %v1120_v32, %v1114_v11  ;;  %v3299_v0 = vrot.slane %v2560_v43, %v2022_v23  ;;  %v3302_v5 = vrot.slane %v2560_v43, %v2031_v27  ;;  %v3312_v55 = vld [vmem:[#allocation42_spill] sm:$0xff] }
 0x197   : > { %v1210_v12 = vadd.f32 %v1208_v44, %v1202_v10  ;;  %v804_v2 = vsel %vm2717_vm1, %v786_v35, 0.0  ;;  %v810_v62 = vsel %vm809_vm12, %v806_v51, %v808_v20  ;;  %v813_v4 = vsel %vm809_vm12, %v808_v20, 0.0  ;;  %v3313_v44 = vld [vmem:[#allocation51_spill] sm:$0xff] }
 0x198   : > { %vm2761_vm9 = vcmp.eq.s32.totalorder %v3299_v0, 1  ;;  %vm2768_vm6 = vcmp.eq.s32.totalorder %v3302_v5, 1  ;;  %v944_v50 = vmul.f32 %v2241_v6, %v804_v2  ;;  %v1033_v48 = vmul.f32 %v2251_v9, %v804_v2  ;;  %v3320_v5 = vld [vmem:[#allocation38_spill] sm:$0xff] }
 0x199   : > { %v1121_v56 = vmul.f32 %v2325_v39, %v804_v2  ;;  %v1209_v43 = vmul.f32 %v2386_v1, %v804_v2  ;;  %v827_v22 = vsel %vm2731_vm15, %v810_v62, 0.0  ;;  %v828_v46 = vsel %vm2738_vm10, %v813_v4, 0.0  ;;  %v832_v21 = vpop.permute.xlu1 %831  ;;  %v857_v32 = vpop.permute.xlu0 %856  ;;  %v3321_v62 = vld [vmem:[#allocation40_spill] sm:$0xff] }
 0x19a   : > { %v954_v61 = vadd.f32 %v2581_v60, %v945_v47  ;;  %v1042_v14 = vadd.f32 %v2361_v41, %v1034_v16  ;;  %v946_v25 = vadd.f32 %v944_v50, %v938_v42  ;;  %v1035_v6 = vadd.f32 %v1033_v48, %v1027_v17  ;;  %v3322_v48 = vld [vmem:[#allocation41_spill] sm:$0xff] }
 0x19b   : > { %v1123_v13 = vadd.f32 %v1121_v56, %v1115_v28  ;;  %v1211_v9 = vadd.f32 %v1209_v43, %v1203_v37  ;;  %v3305_v39 = vrot.slane %v2573_v36, %v2022_v23  ;;  %v3308_v49 = vrot.slane %v2573_v36, %v2031_v27 }
 0x19c   : > { %v960_v41 = vmul.f32 %v2382_v59, %v827_v22  ;;  %v961_v29 = vmul.f32 %v2382_v59, %v828_v46  ;;  %v1048_v18 = vmul.f32 %v2384_v63, %v827_v22  ;;  %v1049_v15 = vmul.f32 %v2384_v63, %v828_v46  ;;  %v3311_v63 = vld [vmem:[#allocation54_spill] sm:$0xff] }
 0x19d   : > { %vm2789_vm5 = vcmp.eq.s32.totalorder %v3305_v39, 1  ;;  %vm2796_vm3 = vcmp.eq.s32.totalorder %v3308_v49, 1  ;;  %v955_v45 = vadd.f32 %v2585_v38, %v946_v25  ;;  %v1043_v52 = vadd.f32 %v2364_v58, %v1035_v6  ;;  %v859_v8 = vpop.permute.xlu1 %858 }
 0x19e   : > { %v1130_v11 = vadd.f32 %v2610_v19, %v1122_v53  ;;  %v1131_v36 = vadd.f32 %v2614_v33, %v1123_v13  ;;  %v962_v30 = vadd.f32 %v960_v41, %v954_v61  ;;  %v1050_v35 = vadd.f32 %v1048_v18, %v1042_v14  ;;  %v3325_v41 = vld [vmem:[#allocation39_spill] sm:$0xff] }
 0x19f   : > { %v1136_v31 = vmul.f32 %v2392_v40, %v827_v22  ;;  %v1137_v3 = vmul.f32 %v2392_v40, %v828_v46  ;;  %v963_v59 = vadd.f32 %v961_v29, %v955_v45  ;;  %v1051_v24 = vadd.f32 %v1049_v15, %v1043_v52  ;;  %v3326_v45 = vld [vmem:[#allocation47_spill] sm:$0xff] }
 0x1a0   : > { %v1218_v51 = vadd.f32 %v2638_v34, %v1210_v12  ;;  %v1219_v7 = vadd.f32 %v3311_v63, %v1211_v9  ;;  %vm884_vm14 = vcmask 769024   ;;  %v1224_v19 = vmul.f32 %v3312_v55, %v827_v22  ;;  %v3323_v22 = vld [vmem:[#allocation46_spill] sm:$0xff]  ;;  %v3324_v9 = vld [vmem:[#allocation44_spill] sm:$0xff] }
 0x1a1   : > { %v1138_v38 = vadd.f32 %v1136_v31, %v1130_v11  ;;  %v1139_v58 = vadd.f32 %v1137_v3, %v1131_v36  ;;  %v1225_v33 = vmul.f32 %v3312_v55, %v828_v46  ;;  %v3314_v10 = vrot.slane %v3313_v44, %v2022_v23  ;;  %v883_v15 = vpop.permute.xlu1 %882  ;;  %v3327_v36 = vld [vmem:[#allocation49_spill] sm:$0xff] }
 0x1a2   : > { %v3317_v34 = vrot.slane %v3313_v44, %v2031_v27  ;;  %v834_v17 = vsel %vm833_vm0, %v830_v26, %v832_v21  ;;  %v837_v28 = vsel %vm833_vm0, %v832_v21, 0.0  ;;  %v861_v20 = vsel %vm860_vm11, %v857_v32, %v859_v8  ;;  %v3330_v44 = vld [vmem:[#allocation45_spill] sm:$0xff] }
 0x1a3   : > { %vm2817_vm7 = vcmp.eq.s32.totalorder %v3314_v10, 1  ;;  %v864_v37 = vsel %vm860_vm11, %v859_v8, 0.0  ;;  %v1226_v47 = vadd.f32 %v1224_v19, %v1218_v51  ;;  %v1227_v16 = vadd.f32 %v1225_v33, %v1219_v7  ;;  %v3329_v19 = vld [vmem:[#allocation43_spill] sm:$0xff] }
 0x1a4   : > { %vm2824_vm8 = vcmp.eq.s32.totalorder %v3317_v34, 1  ;;  %v854_v53 = vsel %vm2761_vm9, %v834_v17, 0.0  ;;  %v855_v0 = vsel %vm2768_vm6, %v837_v28, 0.0  ;;  %v878_v6 = vsel %vm2789_vm5, %v861_v20, 0.0  ;;  %v3331_v28 = vld [vmem:[#allocation48_spill] sm:$0xff] }
 0x1a5   : > { %v968_v12 = vmul.f32 %v3320_v5, %v854_v53  ;;  %v969_v2 = vmul.f32 %v3320_v5, %v855_v0  ;;  %v1056_v4 = vmul.f32 %v3321_v62, %v854_v53  ;;  %v1057_v50 = vmul.f32 %v3321_v62, %v855_v0 }
 0x1a6   : > { %v1144_v56 = vmul.f32 %v3322_v48, %v854_v53  ;;  %v1145_v43 = vmul.f32 %v3322_v48, %v855_v0  ;;  %v1232_v46 = vmul.f32 %v3323_v22, %v854_v53  ;;  %v1233_v57 = vmul.f32 %v3323_v22, %v855_v0  ;;  %v3335_v22 = vld [vmem:[#allocation53_spill] sm:$0xff] }
 0x1a7   : > { %v970_v61 = vadd.f32 %v968_v12, %v962_v30  ;;  %v971_v14 = vadd.f32 %v969_v2, %v963_v59  ;;  %v1058_v54 = vadd.f32 %v1056_v4, %v1050_v35  ;;  %v1059_v26 = vadd.f32 %v1057_v50, %v1051_v24  ;;  %v3328_v24 = vld [vmem:[#allocation50_spill] sm:$0xff]  ;;  %v3332_v4 = vld [vmem:[#allocation52_spill] sm:$0xff] }
 0x1a8   : > { %v1146_v21 = vadd.f32 %v1144_v56, %v1138_v38  ;;  %v1147_v25 = vadd.f32 %v1145_v43, %v1139_v58  ;;  %v879_v13 = vsel %vm2796_vm3, %v864_v37, 0.0  ;;  %v976_v39 = vmul.f32 %v3324_v9, %v878_v6 }
 0x1a9   : > { %v977_v49 = vmul.f32 %v3324_v9, %v879_v13  ;;  %v1064_v29 = vmul.f32 %v3325_v41, %v878_v6  ;;  %v1065_v18 = vmul.f32 %v3325_v41, %v879_v13  ;;  %v1152_v52 = vmul.f32 %v3326_v45, %v878_v6  ;;  %v3341_v41 = vld [vmem:[#allocation56_spill] sm:$0xff] }
 0x1aa   : > { %v1153_v11 = vmul.f32 %v3326_v45, %v879_v13  ;;  %v1240_v30 = vmul.f32 %v3327_v36, %v878_v6  ;;  %v1241_v1 = vmul.f32 %v3327_v36, %v879_v13  ;;  %v978_v35 = vadd.f32 %v976_v39, %v970_v61  ;;  %v1246_v17 = vpop.permute.xlu0 %1245 }
 0x1ab   : > { %v979_v60 = vadd.f32 %v977_v49, %v971_v14  ;;  %v1066_v31 = vadd.f32 %v1064_v29, %v1058_v54  ;;  %v1067_v3 = vadd.f32 %v1065_v18, %v1059_v26  ;;  %v1154_v8 = vadd.f32 %v1152_v52, %v1146_v21  ;;  %v3338_v21 = vld [vmem:[#allocation55_spill] sm:$0xff] }
 0x1ac   : > { %v1155_v59 = vadd.f32 %v1153_v11, %v1147_v25  ;;  %v885_v51 = vsel %vm884_vm14, %v3328_v24, %v883_v15  ;;  %v888_v63 = vsel %vm884_vm14, %v883_v15, 0.0  ;;  %v1234_v58 = vadd.f32 %v1232_v46, %v1226_v47  ;;  %v375_v24 = vld [vmem:[%s3042_s2] sm:$0xf] }
 0x1ad   : > { %v902_v7 = vsel %vm2817_vm7, %v885_v51, 0.0  ;;  %v903_v38 = vsel %vm2824_vm8, %v888_v63, 0.0  ;;  %v1235_v55 = vadd.f32 %v1233_v57, %v1227_v16  ;;  %v3333_v50 = vrot.slane %v3332_v4, %v2022_v23 }
 0x1ae   : > { %v984_v33 = vmul.f32 %v3329_v19, %v902_v7  ;;  %v985_v32 = vmul.f32 %v3329_v19, %v903_v38  ;;  %v1072_v10 = vmul.f32 %v3330_v44, %v902_v7  ;;  %v1073_v34 = vmul.f32 %v3330_v44, %v903_v38 }
 0x1af   : > { %v1160_v20 = vmul.f32 %v3331_v28, %v902_v7  ;;  %v1161_v37 = vmul.f32 %v3331_v28, %v903_v38  ;;  %v1242_v40 = vadd.f32 %v1240_v30, %v1234_v58  ;;  %v1243_v53 = vadd.f32 %v1241_v1, %v1235_v55  ;;  %v374_v1 = vld [vmem:[%s3041_s1] sm:$0xf] }
 0x1b0   : > { %v986_v0 = vadd.f32 %v984_v33, %v978_v35  ;;  %v987_v42 = vadd.f32 %v985_v32, %v979_v60  ;;  %v1074_v5 = vadd.f32 %v1072_v10, %v1066_v31  ;;  %v1075_v47 = vadd.f32 %v1073_v34, %v1067_v3  ;;  %v3354_v32 = vld [vmem:[#allocation4_spill] sm:$0xff]  ;;  %v380_v34 = vld [vmem:[%s3044_s4] sm:$0xff] }
 0x1b1   : > { %v1162_v16 = vadd.f32 %v1160_v20, %v1154_v8  ;;  %v1163_v12 = vadd.f32 %v1161_v37, %v1155_v59  ;;  %v1248_v2 = vmul.f32 %v1246_v17, %v902_v7  ;;  %v1249_v62 = vmul.f32 %v1246_v17, %v903_v38  ;;  %v3358_v28 = vld [vmem:[#allocation6_spill] sm:$0xff] }
 0x1b2   : > { %v999_v48 = vmul.f32 %v3333_v50, %v986_v0  ;;  %v3334_v56 = vrot.slane %v3332_v4, %v2031_v27  ;;  %v3336_v46 = vrot.slane %v3335_v22, %v2022_v23  ;;  %v3337_v61 = vrot.slane %v3335_v22, %v2031_v27  ;;  %v3363_v4 = vld [vmem:[#allocation12_spill] sm:$0xff]  ;;  %v3369_v22 = vld [vmem:[#allocation15_spill] sm:$0xff] }
 0x1b3   : > { %v1250_v54 = vadd.f32 %v1248_v2, %v1242_v40  ;;  %v1251_v26 = vadd.f32 %v1249_v62, %v1243_v53  ;;  %v3339_v25 = vrot.slane %v3338_v21, %v2022_v23  ;;  %v3340_v13 = vrot.slane %v3338_v21, %v2031_v27  ;;  %v3362_v2 = vld [vmem:[#allocation9_spill] sm:$0xff]  ;;  %v3365_v50 = vld [vmem:[#allocation16_spill] sm:$0xff] }
 0x1b4   : > { %v1000_v43 = vmul.f32 %v3334_v56, %v987_v42  ;;  %v1087_v57 = vmul.f32 %v3336_v46, %v1074_v5  ;;  %v1088_v14 = vmul.f32 %v3337_v61, %v1075_v47  ;;  %v3342_v29 = vrot.slane %v3341_v41, %v2022_v23  ;;  %v3371_v61 = vld [vmem:[#allocation14_spill] sm:$0xff] }
 0x1b5   : > { %v1175_v6 = vmul.f32 %v3339_v25, %v1162_v16  ;;  %v1176_v9 = vmul.f32 %v3340_v13, %v1163_v12  ;;  %v3343_v15 = vrot.slane %v3341_v41, %v2031_v27  ;;  %v3344_v35 = vmov 2   ;;  %v3361_v16 = vld [vmem:[#allocation8_spill] sm:$0xff] }
 0x1b6   : > { %v1089_v39 = vadd.f32 %v1087_v57, %v999_v48  ;;  %v1090_v49 = vadd.f32 %v1088_v14, %v1000_v43  ;;  %v1263_v18 = vmul.f32 %v3342_v29, %v1250_v54  ;;  %v3345_v60 = vmov 6   ;;  %v3367_v43 = vld [vmem:[#allocation13_spill] sm:$0xff]  ;;  %v3378_v13 = vld [vmem:[#allocation20_spill] sm:$0xff]  ;;  %v3380_v29 = vld [vmem:[#allocation30_spill] sm:$0xff] }
 0x1b7   : > { %v1264_v45 = vmul.f32 %v3343_v15, %v1251_v26  ;;  %v3346_v31 = vmov 4   ;;  %v3347_v3 = vmov 0   ;;  %v3348_v8 = vmov 5   ;;  %v3372_v54 = vld [vmem:[#allocation17_spill] sm:$0xff]  ;;  %v3381_v15 = vld [vmem:[#allocation31_spill] sm:$0xff] }
 0x1b8   : > { %v1177_v52 = vadd.f32 %v1175_v6, %v1089_v39  ;;  %v1178_v11 = vadd.f32 %v1176_v9, %v1090_v49  ;;  %v3349_v59 = vmov 7   ;;  %v3350_v51 = vmov 8   ;;  %v3374_v26 = vld [vmem:[#allocation21_spill] sm:$0xff]  ;;  %v3376_v6 = vld [vmem:[#allocation18_spill] sm:$0xff] }
 0x1b9   : > { %v3351_v63 = vmov 1   ;;  %vm3352_vm13 = vcmask 916480   ;;  %vm3353_vm2 = vcmask 130048   ;;  %vm3355_vm4 = vnez %v3354_v32 }
 0x1ba   : > { %v2893_v36 = vadd.f32 %v1263_v18, %v1177_v52  ;;  %v2895_v30 = vadd.f32 %v1264_v45, %v1178_v11  ;;  %vm3356_vm1 = vmmov %vm3353_vm2  ;;  %vm3359_vm15 = vnez %v3358_v28  ;;  %v3360_v37 = vmov 3   ;;  %v3390_v28 = vld [vmem:[#allocation24_spill] sm:$0xff] }
 0x1bb   : > { %vm3357_vm12 = vmmov %vm3352_vm13  ;;  %vm3364_vm10 = vnez %v3363_v4  ;;  %vm3368_vm0 = vnez %v3367_v43  ;;  %v546_v14 = vrot.slane %v3371_v61, %v2031_v27  ;;  %vm3373_vm11 = vnez %v3372_v54  ;;  %v3398_v61 = vld [vmem:[#allocation27_spill] sm:$0xff] }
 0x1bc   : > { %1287 = vrot.lane.b32.xlu1 %v2895_v30, %s1768_s9  ;;  %1285 = vrot.lane.b32.xlu0 %v2893_v36, %s1768_s9  ;;  %v3366_v48 = vsel %vm3364_vm10, %v3365_v50, 0.0  ;;  %v3370_v46 = vsel %vm3368_vm0, %v3369_v22, 0.0  ;;  %v3375_v21 = vsel %vm3373_vm11, %v3374_v26, 0.0  ;;  %vm3377_vm9 = vnez %v3376_v6  ;;  %v3395_v50 = vld [vmem:[#allocation11_spill] sm:$0xff] }
 0x1bd   : > { %v3379_v9 = vsel %vm3377_vm9, %v3378_v13, 0.0  ;;  %vm3384_vm6 = vcmask 924672   ;;  %vm548_vm5 = vcmp.eq.s32.totalorder %v546_v14, 1  ;;  %vm3393_vm14 = vcmask 908288  }
 0x1c0   : > { %1295 = vrot.lane.b32.xlu1 %v2895_v30, %s1769_s10  ;;  %1293 = vrot.lane.b32.xlu0 %v2893_v36, %s1769_s10 }
 0x1c4   : > { %1349 = vperm.xlu1 %1727, %v374_v1   ;;  %1365 = vperm.xlu0 %1729, %v374_v1  }
 0x1c8   : > { %1728 = vset.pattern.permute.xlu1 %v3344_v35  ;;  %1732 = vset.pattern.permute.xlu0 %v3345_v60  ;;  %v3382_v60 = vld [vmem:[#allocation2_spill] sm:$0xff] }
 0x1c9   : > { %1357 = vperm.xlu1 %1728, %v374_v1   ;;  %1390 = vperm.xlu0 %1732, %v374_v1  }
 0x1cd   : > { %1730 = vset.pattern.permute.xlu1 %v3346_v31  ;;  %1733 = vset.pattern.permute.xlu0 %v3347_v3 }
 0x1ce   : > { %1373 = vperm.xlu1 %1730, %v374_v1   ;;  %1341 = vperm.xlu0 %1733, %v374_v1  }
 0x1d2   : > { %1731 = vset.pattern.permute.xlu1 %v3348_v8  ;;  %1269 = vrot.lane.b32.xlu0 %v2893_v36, %s1771_s12  ;;  %v3383_v8 = vld [vmem:[#allocation23_spill] sm:$0xff] }
 0x1d3   : > { %1382 = vperm.xlu1 %1731, %v374_v1  }
 0x1d6   : > { %1277 = vrot.lane.b32.xlu0 %v2893_v36, %s1770_s11 }
 0x1d7   : > { %1734 = vset.pattern.permute.xlu1 %v3349_v59  ;;  %v532_v59 = vsel %vm3384_vm6, %v3383_v8, 0.0 }
 0x1d8   : > { %1398 = vperm.xlu1 %1734, %v374_v1  }
 0x1da   : > { %1415 = vperm.xlu0 %1733, %v375_v24  }
 0x1dc   : > { %1735 = vset.pattern.permute.xlu1 %v3350_v51 }
 0x1dd   : > { %1406 = vperm.xlu1 %1735, %v374_v1   ;;  %v1741_v1 = vld [vmem:[%s1860_s8] sm:$0xff]  ;;  %s1648_s8 = sshll.u32 %s3424_s24, 4 }
 0x1de   : > { %s372_s13 = scalar_lea.vmem %s3047_s7, %s1648_s8 }
 0x1e1   : > { %1271 = vrot.lane.b32.xlu1 %v2895_v30, %s1771_s12 }
 0x1e2   : > { %1736 = vset.pattern.permute.xlu1 %v3351_v63  ;;  %v3385_v63 = vld [vmem:[#allocation19_spill] sm:$0xff] }
 0x1e5   : > { %1279 = vrot.lane.b32.xlu1 %v2895_v30, %s1770_s11 }
 0x22e   : > { %v1288_v7 = vpop.permute.xlu1 %1287  ;;  %v1286_v38 = vpop.permute.xlu0 %1285 }
 0x22f   : > { %v1289_v19 = vsel %vm3352_vm13, %v1286_v38, %v1288_v7  ;;  %v1292_v17 = vsel %vm3357_vm12, %v1288_v7, 0.0  ;;  %v594_v7 = vrot.slane %v3385_v63, %v2031_v27  ;;  %vm3400_vm13 = vcmask 1039360  }
 0x231   : > { %vm596_vm7 = vcmp.eq.s32.totalorder %v594_v7, 1  ;;  %v3411_v7 = vld [vmem:[#allocation7_spill] sm:$0xff] }
 0x232   : > { %v1296_v58 = vpop.permute.xlu1 %1295  ;;  %v1294_v55 = vpop.permute.xlu0 %1293 }
 0x233   : > { %v1300_v33 = vsel %vm3353_vm2, 0.0, %v1294_v55  ;;  %v1297_v10 = vsel %vm3356_vm1, %v1294_v55, %v1296_v58  ;;  %v3386_v55 = vld [vmem:[#allocation33_spill] sm:$0xff]  ;;  %vm3401_vm2 = vcmask 7168   ;;  %vm3403_vm1 = vmmov %vm3400_vm13 }
 0x234   : > { %v2931_v44 = vsel %vm3355_vm4, %v1300_v33, %v1289_v19  ;;  %v2944_v20 = vsel %vm3359_vm15, %v1297_v10, %v1292_v17  ;;  %v3387_v33 = vld [vmem:[#allocation32_spill] sm:$0xff]  ;;  %v550_v10 = vsel %vm548_vm5, %v532_v59, 0.0  ;;  %v3388_v17 = vld [vmem:[#allocation22_spill] sm:$0xff]  ;;  %vm3402_vm4 = vmmov %vm3401_vm2 }
 0x235   : > { %1315 = vrot.lane.b32.xlu0 %v2931_v44, %s1771_s12  ;;  %1307 = vrot.lane.b32.xlu1 %v2931_v44, %s1770_s11  ;;  %vm3389_vm3 = vnez %v3388_v17  ;;  %vm3412_vm10 = vmmov %vm3401_vm2  ;;  %v3416_v17 = vld [vmem:[#allocation37_spill] sm:$0xff] }
 0x236   : > { %vm3413_vm0 = vmmov %vm3401_vm2 }
 0x237   : > { %vm3414_vm11 = vmmov %vm3403_vm1 }
 0x238   : > { %vm3415_vm9 = vmmov %vm3403_vm1 }
 0x239   : > { %1430 = vperm.xlu0 %1733, %v380_v34   ;;  %1309 = vrot.lane.b32.xlu1 %v2944_v20, %s1770_s11 }
 0x23d   : > { %1737 = vset.pattern.permute.xlu0 %v3344_v35  ;;  %1317 = vrot.lane.b32.xlu1 %v2944_v20, %s1771_s12 }
 0x23e   : > { %1462 = vperm.xlu0 %1737, %v380_v34  }
 0x241   : > { %1446 = vperm.xlu1 %1736, %v380_v34  }
 0x242   : > { %1739 = vset.pattern.permute.xlu0 %v3360_v37 }
 0x243   : > { %v1350_v40 = vpop.permute.xlu1 %1349  ;;  %v1366_v53 = vpop.permute.xlu0 %1365 }
 0x244   : > { %v1352_v12 = vmul.f32 %v1350_v40, %v3361_v16  ;;  %v1353_v62 = vmul.f32 %v1350_v40, %v3362_v2  ;;  %v1368_v18 = vmul.f32 %v1366_v53, %v3380_v29  ;;  %v1369_v45 = vmul.f32 %v1366_v53, %v3381_v15 }
 0x245   : > { %1738 = vset.pattern.permute.xlu1 %v3360_v37  ;;  %v3391_v37 = vsel %vm3389_vm3, %v3390_v28, 0.0  ;;  %v3417_v28 = vld [vmem:[#allocation36_spill] sm:$0xff] }
 0x246   : > { %1478 = vperm.xlu1 %1738, %v380_v34  }
 0x248   : > { %v1391_v0 = vpop.permute.xlu0 %1390  ;;  %v1358_v42 = vpop.permute.xlu1 %1357 }
 0x249   : > { %v1360_v25 = vmul.f32 %v1358_v42, %v3375_v21  ;;  %v1361_v39 = vmul.f32 %v1358_v42, %v3379_v9  ;;  %v1393_v40 = vmul.f32 %v1391_v0, %v3391_v37  ;;  %v1394_v53 = vmul.f32 %v1391_v0, %v550_v10 }
 0x24d   : > { %v1342_v5 = vpop.permute.xlu0 %1341  ;;  %v1374_v47 = vpop.permute.xlu1 %1373 }
 0x24e   : > { %v1344_v56 = vmul.f32 %v1342_v5, %v3366_v48  ;;  %v1345_v57 = vmul.f32 %v1342_v5, %v3370_v46  ;;  %v1377_v35 = vmul.f32 %v1741_v1, %v1374_v47  ;;  %v1378_v31 = vmul.f32 %v1374_v47, %v3382_v60  ;;  %v3392_v47 = vld [vmem:[#allocation26_spill] sm:$0xff]  ;;  %v3408_v1 = vld [vmem:[#allocation35_spill] sm:$0xff] }
 0x24f   : > { %v583_v16 = vsel %vm3393_vm14, %v3392_v47, 0.0  ;;  %v3409_v60 = vld [vmem:[#allocation34_spill] sm:$0xff] }
 0x250   : > { %v1354_v49 = vadd.f32 %v1352_v12, %v1344_v56  ;;  %v1355_v41 = vadd.f32 %v1353_v62, %v1345_v57  ;;  %v3394_v62 = vld [vmem:[#allocation10_spill] sm:$0xff]  ;;  %v598_v22 = vsel %vm596_vm7, %v583_v16, 0.0  ;;  %v3396_v57 = vld [vmem:[#allocation25_spill] sm:$0xff] }
 0x251   : > { %vm3397_vm8 = vnez %v3396_v57  ;;  %v1270_v6 = vpop.permute.xlu0 %1269 }
 0x252   : > { %v1362_v52 = vadd.f32 %v1360_v25, %v1354_v49  ;;  %v1363_v11 = vadd.f32 %v1361_v39, %v1355_v41  ;;  %v1383_v3 = vpop.permute.xlu1 %1382  ;;  %v3399_v0 = vsel %vm3397_vm8, %v3398_v61, 0.0 }
 0x253   : > { %v1385_v19 = vmul.f32 %v1383_v3, %v3386_v55  ;;  %v1386_v32 = vmul.f32 %v1383_v3, %v3387_v33 }
 0x254   : > { %v1370_v24 = vadd.f32 %v1368_v18, %v1362_v52  ;;  %v1371_v51 = vadd.f32 %v1369_v45, %v1363_v11  ;;  %v3404_v18 = vld [vmem:[#allocation29_spill] sm:$0xff]  ;;  %v3406_v45 = vld [vmem:[#allocation28_spill] sm:$0xff] }
 0x255   : > { %v1278_v9 = vpop.permute.xlu0 %1277  ;;  %vm3405_vm12 = vnez %v3404_v18  ;;  %vm3407_vm15 = vnez %v3406_v45 }
 0x256   : > { %v1379_v38 = vadd.f32 %v1377_v35, %v1370_v24  ;;  %v1380_v58 = vadd.f32 %v1378_v31, %v1371_v51  ;;  %v1284_v41 = vsel %vm3402_vm4, 0.0, %v1278_v9  ;;  %v3410_v51 = vld [vmem:[#allocation5_spill] sm:$0xff] }
 0x257   : > { %v1399_v34 = vpop.permute.xlu1 %1398  ;;  %v1329_v63 = vmul.f32 %v2931_v44, %v3410_v51 }
 0x258   : > { %v1387_v42 = vadd.f32 %v1385_v19, %v1379_v38  ;;  %v1388_v5 = vadd.f32 %v1386_v32, %v1380_v58  ;;  %v1401_v4 = vmul.f32 %v1399_v34, %v3394_v62  ;;  %v1402_v48 = vmul.f32 %v1399_v34, %v3395_v50 }
 0x259   : > { %v1416_v3 = vpop.permute.xlu0 %1415  ;;  %v1330_v38 = vmul.f32 %v2944_v20, %v3411_v7 }
 0x25a   : > { %v1395_v12 = vadd.f32 %v1393_v40, %v1387_v42  ;;  %v1396_v2 = vadd.f32 %v1394_v53, %v1388_v5 }
 0x25c   : > { %v1403_v56 = vadd.f32 %v1401_v4, %v1395_v12  ;;  %v1404_v43 = vadd.f32 %v1402_v48, %v1396_v2  ;;  %v1407_v46 = vpop.permute.xlu1 %1406  ;;  %v3418_v4 = vld [vmem:[#allocation3_spill] sm:$0xff] }
 0x25d   : > { %v1409_v14 = vmul.f32 %v1407_v46, %v3399_v0  ;;  %v1410_v54 = vmul.f32 %v1407_v46, %v598_v22  ;;  %v1467_v50 = vsub.s32 2, %v3418_v4 }
 0x25f   : > { %v1411_v26 = vadd.f32 %v1409_v14, %v1403_v56  ;;  %v1412_v21 = vadd.f32 %v1410_v54, %v1404_v43  ;;  %v1483_v14 = vsub.s32 3, %v3418_v4 }
 0x260   : > { %v1272_v25 = vpop.permute.xlu1 %1271 }
 0x261   : > { %v1273_v39 = vsel %vm3400_vm13, %v1270_v6, %v1272_v25  ;;  %v1276_v29 = vsel %vm3403_vm1, %v1272_v25, 0.0  ;;  %v1418_v42 = vadd.f32 %v1416_v3, %v1411_v26  ;;  %v1419_v5 = vadd.f32 %v1416_v3, %v1412_v21 }
 0x262   : > { %v1301_v15 = vsel %vm3405_vm12, %v1284_v41, %v1273_v39 }
 0x263   : > { %v1325_v35 = vmul.f32 %v1301_v15, %v3408_v1 }
 0x264   : > { %v1280_v13 = vpop.permute.xlu1 %1279 }
 0x265   : > { %v1281_v49 = vsel %vm3401_vm2, %v1278_v9, %v1280_v13  ;;  %v1327_v59 = vadd.f32 %v1325_v35, %v2893_v36 }
 0x266   : > { %v1302_v52 = vsel %vm3407_vm15, %v1281_v49, %v1276_v29 }
 0x267   : > { %v1326_v31 = vmul.f32 %v1302_v52, %v3409_v60  ;;  %v1331_v44 = vadd.f32 %v1329_v63, %v1327_v59 }
 0x269   : > { %v1328_v24 = vadd.f32 %v1326_v31, %v2895_v30 }
 0x26b   : > { %v1332_v34 = vadd.f32 %v1330_v38, %v1328_v24 }
 0x2a7   : > { %v1308_v11 = vpop.permute.xlu1 %1307  ;;  %v1316_v58 = vpop.permute.xlu0 %1315 }
 0x2a8   : > { %v1314_v19 = vsel %vm3412_vm10, 0.0, %v1308_v11 }
 0x2ab   : > { %v1310_v8 = vpop.permute.xlu1 %1309 }
 0x2ac   : > { %v1311_v33 = vsel %vm3413_vm0, %v1308_v11, %v1310_v8 }
 0x2af   : > { %v1318_v55 = vpop.permute.xlu1 %1317 }
 0x2b0   : > { %v1319_v32 = vsel %vm3414_vm11, %v1316_v58, %v1318_v55  ;;  %v1322_v10 = vsel %vm3415_vm9, %v1318_v55, 0.0 }
 0x2b1   : > { %v1323_v36 = vsel %vm3405_vm12, %v1314_v19, %v1319_v32  ;;  %v1324_v30 = vsel %vm3407_vm15, %v1311_v33, %v1322_v10 }
 0x2b2   : > { %v1333_v20 = vmul.f32 %v1323_v36, %v3416_v17  ;;  %v1334_v37 = vmul.f32 %v1324_v30, %v3417_v28 }
 0x2b4   : > { %v1335_v40 = vadd.f32 %v1333_v20, %v1331_v44  ;;  %v1336_v53 = vadd.f32 %v1334_v37, %v1332_v34 }
 0x2b6   : > { %v1337_v47 = vmul.f32 0.5, %v1335_v40  ;;  %v1338_v16 = vmul.f32 0.5, %v1336_v53 }
 0x2b8   : > { %v1420_v12 = vadd.f32 %v1418_v42, %v1337_v47  ;;  %v1421_v2 = vadd.f32 %v1419_v5, %v1338_v16  ;;  %v1431_v62 = vpop.permute.xlu0 %1430 }
 0x2ba   : > { %v1436_v48 = vrot.slane %v1420_v12, %v2022_v23  ;;  %v1440_v56 = vrot.slane %v1421_v2, %v2022_v23  ;;  %v1452_v43 = vrot.slane %v1420_v12, %v2031_v27  ;;  %v1456_v22 = vrot.slane %v1421_v2, %v2031_v27 }
 0x2bb   : > { %v1468_v46 = vrot.slane %v1420_v12, %v1467_v50  ;;  %v1472_v57 = vrot.slane %v1421_v2, %v1467_v50  ;;  %v1484_v23 = vrot.slane %v1420_v12, %v1483_v14  ;;  %v1488_v49 = vrot.slane %v1421_v2, %v1483_v14 }
 0x2bc   : > { %v1441_v54 = vmul.f32 %v1436_v48, %v1431_v62  ;;  %v1442_v26 = vmul.f32 %v1440_v56, %v1431_v62 }
 0x2bd   : > { %v1463_v61 = vpop.permute.xlu0 %1462 }
 0x2be   : > { %v1473_v6 = vmul.f32 %v1468_v46, %v1463_v61  ;;  %v1474_v13 = vmul.f32 %v1472_v57, %v1463_v61 }
 0x2c0   : > { %v1447_v0 = vpop.permute.xlu1 %1446 }
 0x2c1   : > { %v1457_v21 = vmul.f32 %v1452_v43, %v1447_v0  ;;  %v1458_v25 = vmul.f32 %v1456_v22, %v1447_v0 }
 0x2c3   : > { %v1459_v9 = vadd.f32 %v1457_v21, %v1441_v54  ;;  %v1460_v39 = vadd.f32 %v1458_v25, %v1442_v26 }
 0x2c5   : > { %v1479_v41 = vpop.permute.xlu1 %1478  ;;  %v1475_v29 = vadd.f32 %v1473_v6, %v1459_v9  ;;  %v1476_v27 = vadd.f32 %v1474_v13, %v1460_v39 }
 0x2c6   : > { %v1489_v18 = vmul.f32 %v1484_v23, %v1479_v41  ;;  %v1490_v15 = vmul.f32 %v1488_v49, %v1479_v41 }
 0x2c8   : > { %v1491_v45 = vadd.f32 %v1489_v18, %v1475_v29  ;;  %v1492_v52 = vadd.f32 %v1490_v15, %v1476_v27 }
 0x2ca   : > { %1497 = vst [vmem:[%s372_s13] sm:$0xff] %v1491_v45  ;;  %1498 = vst [vmem:[%s372_s13 + $0x8] sm:$0xff] %v1492_v52 }
 0x2cb PF: > { %s17_s26 = sadd.s32 1, %s1764_s26   ;;  %s3419_s24 = smov %s1760_s25 }
 0x2cc   : > { %p14_p5 = scmp.ge.s32.totalorder %s17_s26, 4   ;;  %s3420_s25 = smov %s3422_s27 }
 0x2ce   :  { %16 = sbr.rel (!%p14_p5) target bundleno = 2 (0x2), region = 94 }

</bundles_post_ra>
